<compile_context>
chip_gen: v7x
topology: tpu7x:2x2x1
jax: 0.10.0
libtpu: 0.0.40
codegen_flags: <defaults>
</compile_context>

<pallas_src>
import jax
import jax.numpy as jnp
from jax import lax
from jax.experimental import pallas as pl
from jax.experimental.pallas import tpu as pltpu

# ---- config (consistent with MambaLMConfig defaults: d_conv=4, d_state=16,
#      d_delta = ceil(d_model/16), d_inner = 2*d_model, tied lm_head, batch = 1) ----
D_MODEL  = 32
D_INNER  = 2 * D_MODEL           # 64
D_STATE  = 16
D_CONV   = 4
DT_RANK  = (D_MODEL + 15) // 16  # 2
N_LAYERS = 2
VOCAB    = 128                   # padded to a lane multiple (pad_vocab_size_multiple)
B        = 1
EPS      = 1e-5


def _silu(x):
    return x * (1.0 / (1.0 + jnp.exp(-x)))


def _softplus(x):
    return jnp.maximum(x, 0.0) + jnp.log1p(jnp.exp(-jnp.abs(x)))


def _rms_norm(x, w):
    return x * lax.rsqrt(jnp.mean(x * x, axis=-1, keepdims=True) + EPS) * w


# ----------------------------------------------------------------------------- kernel
def mamba_lm_step_kernel(
    # scalar prefetch
    tok_ref,        # (1,) int32 in SMEM
    # inputs (all fully resident in VMEM)
    hs_ref,         # (L, d_state, d_inner)        SSM state cache
    conv_ref,       # (L, d_conv-1, d_inner)       conv input cache
    emb_ref,        # (VOCAB, d_model)             embedding table (gather source)
    lm_head_ref,    # (d_model, VOCAB)             tied lm_head, pre-transposed
    w_in_ref,       # (L, d_model, 2*d_inner)      fused [in_proj_x | in_proj_z]^T
    w_x_ref,        # (L, d_inner, d_inner+2*d_state)  fused [W_delta | x_proj_B | x_proj_C]^T
    w_out_ref,      # (L, d_inner, d_model)        out_proj^T
    conv_w_ref,     # (L, d_conv, d_inner)         depthwise conv weights
    a_ref,          # (L, d_state, d_inner)        A^T = (-exp(A_log))^T
    vecs_ref,       # (L, 3, d_inner)              rows: conv_b, dt_b, D
    norms_ref,      # (L+1, d_model)               rows 0..L-1: layer norm w, row L: final norm w
    # outputs
    logits_ref,     # (B, VOCAB)
    hs_out_ref,     # (L, d_state, d_inner)        aliased with hs_ref's HBM buffer
    conv_out_ref,   # (L, d_conv-1, d_inner)       aliased with conv_ref's HBM buffer
):
    # ---- embedding lookup as an (exact) one-hot matmul; avoids a separate XLA gather ----
    tok = tok_ref[0]
    vocab_iota = lax.broadcasted_iota(jnp.int32, (B, VOCAB), 1)
    onehot = (vocab_iota == tok).astype(jnp.float32)                         # (B, VOCAB)
    x = jnp.dot(onehot, emb_ref[...], preferred_element_type=jnp.float32)    # (B, d_model)

    norms = norms_ref[...]                                                   # (L+1, d_model)

    # ---- all layers unrolled; residual `x` carried in registers ----
    for l in range(N_LAYERS):
        xn = _rms_norm(x, norms[l:l + 1, :])                                 # (B, d_model)

        # fused in_proj:   [x_in | z] = xn @ W_in^T
        xz = jnp.dot(xn, w_in_ref[l], preferred_element_type=jnp.float32)    # (B, 2*d_inner)
        x_in = xz[:, :D_INNER]                                               # (B, d_inner)
        z    = xz[:, D_INNER:]                                               # (B, d_inner)

        # causal depthwise conv step over [cache, x_in], unrolled (d_conv = 4)
        vec = vecs_ref[l]                                                    # (3, d_inner)
        cw  = conv_w_ref[l]                                                  # (d_conv, d_inner)
        cc  = conv_ref[l]                                                    # (d_conv-1, d_inner)
        xc = vec[0:1, :] + cw[D_CONV - 1:D_CONV, :] * x_in
        for k in range(D_CONV - 1):
            xc = xc + cw[k:k + 1, :] * cc[k:k + 1, :]
        xs = _silu(xc)                                                       # (B, d_inner)

        # fused delta/B/C projection (dt_proj o x_proj_dt pre-folded into W_delta on the host)
        dbc   = jnp.dot(xs, w_x_ref[l], preferred_element_type=jnp.float32)  # (B, d_inner+2*d_state)
        delta = _softplus(dbc[:, :D_INNER] + vec[1:2, :])                    # (B, d_inner)
        Bm    = dbc[:, D_INNER:D_INNER + D_STATE]                            # (B, d_state)
        Cm    = dbc[:, D_INNER + D_STATE:]                                   # (B, d_state)

        # selective SSM update, state kept (d_state, d_inner) so d_inner is on the lane axis
        dA  = jnp.exp(delta * a_ref[l])                                      # (d_state, d_inner)
        dxs = delta * xs                                                     # (B, d_inner)
        dBx = (Bm[:, :, None] * dxs[:, None, :])[0]                          # (d_state, d_inner)
        h   = dA * hs_ref[l] + dBx                                           # (d_state, d_inner)
        y   = jnp.dot(Cm, h, preferred_element_type=jnp.float32)             # (B, d_inner)
        y   = y + vec[2:3, :] * xs

        # gate + out_proj + residual
        x = x + jnp.dot(y * _silu(z), w_out_ref[l],
                        preferred_element_type=jnp.float32)                  # (B, d_model)

        # ---- cache writeback (HBM buffers aliased with the inputs) ----
        hs_out_ref[l] = h
        for k in range(D_CONV - 2):
            conv_out_ref[l, k:k + 1, :] = cc[k + 1:k + 2, :]
        conv_out_ref[l, D_CONV - 2:D_CONV - 1, :] = x_in

    # ---- final RMSNorm + tied lm_head (lane-dense 128-wide logits store) ----
    xf = _rms_norm(x, norms[N_LAYERS:N_LAYERS + 1, :])
    logits_ref[...] = jnp.dot(xf, lm_head_ref[...], preferred_element_type=jnp.float32)


# ----------------------------------------------------------------------------- wrapper
def _full_spec(shape):
    zeros = (0,) * len(shape)
    # index_map args: (grid index, scalar-prefetch ref)
    return pl.BlockSpec(shape, lambda i, tok, _z=zeros: _z)


def prepare_params(p):
    """One-time host-side packing: fuse + pre-transpose weights into kernel layout."""
    w_delta = jnp.einsum("lir,lrj->lij", p["dt_w"], p["xproj_dt"])           # (L, d_inner, d_inner)
    w_x = jnp.concatenate(
        [jnp.transpose(w_delta, (0, 2, 1)),
         jnp.transpose(p["xproj_B"], (0, 2, 1)),
         jnp.transpose(p["xproj_C"], (0, 2, 1))], axis=2)                    # (L, d_inner, d_inner+2*d_state)
    w_in = jnp.transpose(
        jnp.concatenate([p["in_proj_x"], p["in_proj_z"]], axis=1), (0, 2, 1))  # (L, d_model, 2*d_inner)
    return {
        "emb":       p["embedding"],                                         # (VOCAB, d_model)
        "lm_head_T": p["embedding"].T,                                       # (d_model, VOCAB)
        "w_in":      w_in,
        "w_x":       w_x,
        "w_out":     jnp.transpose(p["out_proj"], (0, 2, 1)),                # (L, d_inner, d_model)
        "conv_w":    p["conv_w"][:, :, 0, :],                                # (L, d_conv, d_inner)
        "a_T":       jnp.transpose(-jnp.exp(p["A_log"]), (0, 2, 1)),         # (L, d_state, d_inner)
        "vecs":      jnp.concatenate([p["conv_b"], p["dt_b"], p["D"]], axis=1),  # (L, 3, d_inner)
        "norms":     jnp.concatenate([p["norm_w"][:, 0, :], p["norm_f"]], axis=0),  # (L+1, d_model)
    }


def mamba_lm_forward(token, hs, conv_cache, kp):
    """token: (1,) int32; hs: (L, d_state, d_inner) f32; conv_cache: (L, d_conv-1, d_inner) f32."""
    inputs = (token, hs, conv_cache,
              kp["emb"], kp["lm_head_T"], kp["w_in"], kp["w_x"], kp["w_out"],
              kp["conv_w"], kp["a_T"], kp["vecs"], kp["norms"])
    in_specs = [_full_spec(a.shape) for a in inputs[1:]]     # token is scalar-prefetched
    out_shape = (
        jax.ShapeDtypeStruct((B, VOCAB), jnp.float32),
        jax.ShapeDtypeStruct(hs.shape, jnp.float32),
        jax.ShapeDtypeStruct(conv_cache.shape, jnp.float32),
    )
    out_specs = [_full_spec((B, VOCAB)), _full_spec(hs.shape), _full_spec(conv_cache.shape)]

    logits, hs_new, conv_new = pl.pallas_call(
        mamba_lm_step_kernel,
        out_shape=out_shape,
        grid_spec=pltpu.PrefetchScalarGridSpec(
            num_scalar_prefetch=1,
            grid=(1,),
            in_specs=in_specs,
            out_specs=out_specs,
        ),
        # flat input indices (incl. scalar prefetch): 0=token, 1=hs, 2=conv_cache
        input_output_aliases={1: 1, 2: 2},
        compiler_params=pltpu.CompilerParams(
            dimension_semantics=("arbitrary",),
        ),
    )(*inputs)
    return logits, (hs_new, conv_new)


# ----------------------------------------------------------------------------- pure-JAX reference
def reference_forward(token, hs, conv_cache, p):
    """Uses the raw (unfused, untransposed) parameters; same math as the PyTorch module."""
    x = p["embedding"][token].astype(jnp.float32)                            # (1, d_model)
    hs_new, conv_new = [], []
    for l in range(N_LAYERS):
        xn = _rms_norm(x, p["norm_w"][l, 0])
        xi = xn @ p["in_proj_x"][l].T                                        # (1, d_inner)
        z  = xn @ p["in_proj_z"][l].T
        cc = conv_cache[l]                                                   # (d_conv-1, d_inner)
        xc = p["conv_b"][l, 0] + p["conv_w"][l, D_CONV - 1, 0] * xi
        for k in range(D_CONV - 1):
            xc = xc + p["conv_w"][l, k, 0] * cc[k]
        xs = _silu(xc)
        A  = -jnp.exp(p["A_log"][l])                                         # (d_inner, d_state)
        di = xs @ p["xproj_dt"][l].T
        Bm = xs @ p["xproj_B"][l].T                                          # (1, d_state)
        Cm = xs @ p["xproj_C"][l].T
        delta = _softplus(di @ p["dt_w"][l].T + p["dt_b"][l, 0])             # (1, d_inner)
        dA = jnp.exp(delta * A.T)                                            # (d_state, d_inner)
        BX = Bm[0][:, None] * (delta * xs)                                   # (d_state, d_inner)
        h  = dA * hs[l] + BX
        y  = Cm @ h + p["D"][l, 0] * xs                                      # (1, d_inner)
        x  = (y * _silu(z)) @ p["out_proj"][l].T + x
        hs_new.append(h)
        conv_new.append(jnp.concatenate([cc[1:], xi], axis=0))
    xf = _rms_norm(x, p["norm_f"][0])
    logits = xf @ p["embedding"].T
    return logits, (jnp.stack(hs_new), jnp.stack(conv_new))


# ----------------------------------------------------------------------------- params
def init_params(key):
    ks = jax.random.split(key, 12)
    s = 0.05
    return {
        "embedding": jax.random.normal(ks[0], (VOCAB, D_MODEL), jnp.float32) * 0.02,
        "in_proj_x": jax.random.normal(ks[1], (N_LAYERS, D_INNER, D_MODEL), jnp.float32) * s,
        "in_proj_z": jax.random.normal(ks[2], (N_LAYERS, D_INNER, D_MODEL), jnp.float32) * s,
        "conv_w":    jax.random.normal(ks[3], (N_LAYERS, D_CONV, 1, D_INNER), jnp.float32) * s,
        "conv_b":    jax.random.normal(ks[4], (N_LAYERS, 1, D_INNER), jnp.float32) * s,
        "xproj_dt":  jax.random.normal(ks[5], (N_LAYERS, DT_RANK, D_INNER), jnp.float32) * s,
        "xproj_B":   jax.random.normal(ks[6], (N_LAYERS, D_STATE, D_INNER), jnp.float32) * s,
        "xproj_C":   jax.random.normal(ks[7], (N_LAYERS, D_STATE, D_INNER), jnp.float32) * s,
        "dt_w":      jax.random.normal(ks[8], (N_LAYERS, D_INNER, DT_RANK), jnp.float32) * s,
        "dt_b":      jax.random.normal(ks[9], (N_LAYERS, 1, D_INNER), jnp.float32) * s,
        "A_log":     jnp.log(jnp.broadcast_to(
                         jnp.arange(1, D_STATE + 1, dtype=jnp.float32),
                         (N_LAYERS, D_INNER, D_STATE))),
        "D":         jnp.ones((N_LAYERS, 1, D_INNER), jnp.float32),
        "out_proj":  jax.random.normal(ks[10], (N_LAYERS, D_MODEL, D_INNER), jnp.float32) * s,
        "norm_w":    jnp.ones((N_LAYERS, 1, D_MODEL), jnp.float32),
        "norm_f":    jnp.ones((1, D_MODEL), jnp.float32),
    }


# ----------------------------------------------------------------------------- main
if __name__ == "__main__":
    root = jax.random.PRNGKey(0)
    kparam, kh, kc = jax.random.split(root, 3)
    params = init_params(kparam)
    prepared = prepare_params(params)   # one-time host-side weight packing

    token = jnp.array([5], dtype=jnp.int32)                                   # (B,)
    hs0   = jax.random.normal(kh, (N_LAYERS, D_STATE, D_INNER), jnp.float32) * 0.1
    cc0   = jax.random.normal(kc, (N_LAYERS, D_CONV - 1, D_INNER), jnp.float32) * 0.1

    # reference first (kernel aliases/updates the cache buffers in place downstream of jit donation)
    ref_logits, (ref_hs, ref_cc) = reference_forward(token, hs0, cc0, params)
    jax.block_until_ready((ref_logits, ref_hs, ref_cc))

    logits, (hs1, cc1) = mamba_lm_forward(token, hs0, cc0, prepared)
    jax.block_until_ready((logits, hs1, cc1))

    assert jnp.allclose(logits, ref_logits, atol=1e-2, rtol=1e-2), "logits mismatch"
    assert jnp.allclose(hs1, ref_hs, atol=1e-2, rtol=1e-2), "hs cache mismatch"
    assert jnp.allclose(cc1, ref_cc, atol=1e-2, rtol=1e-2), "conv cache mismatch"

    print("KERNEL_OK")
</pallas_src>

<mosaic_0001>
module attributes {stable_mosaic.version = 11 : i64} {
  func.func @mamba_lm_step_kernel(%arg0: i32, %arg1: memref<1xi32, #tpu.memory_space<smem>>, %arg2: memref<2x16x64xf32, #tpu.memory_space<vmem>>, %arg3: memref<2x3x64xf32, #tpu.memory_space<vmem>>, %arg4: memref<128x32xf32, #tpu.memory_space<vmem>>, %arg5: memref<32x128xf32, #tpu.memory_space<vmem>>, %arg6: memref<2x32x128xf32, #tpu.memory_space<vmem>>, %arg7: memref<2x64x96xf32, #tpu.memory_space<vmem>>, %arg8: memref<2x64x32xf32, #tpu.memory_space<vmem>>, %arg9: memref<2x4x64xf32, #tpu.memory_space<vmem>>, %arg10: memref<2x16x64xf32, #tpu.memory_space<vmem>>, %arg11: memref<2x3x64xf32, #tpu.memory_space<vmem>>, %arg12: memref<3x32xf32, #tpu.memory_space<vmem>>, %arg13: memref<1x128xf32, #tpu.memory_space<vmem>>, %arg14: memref<2x16x64xf32, #tpu.memory_space<vmem>>, %arg15: memref<2x3x64xf32, #tpu.memory_space<vmem>>) attributes {dimension_semantics = [#tpu.dimension_semantics<arbitrary>], iteration_bounds = array<i64: 1>, scalar_prefetch = 1 : i64, scratch_operands = 0 : i64, tpu.core_type = #tpu.core_type<tc>, window_params = [{pipeline_mode = #tpu.pipeline_mode<synchronous>, transform_indices = @transform_0, window_bounds = array<i64: 2, 16, 64>}, {pipeline_mode = #tpu.pipeline_mode<synchronous>, transform_indices = @transform_1, window_bounds = array<i64: 2, 3, 64>}, {pipeline_mode = #tpu.pipeline_mode<synchronous>, transform_indices = @transform_2, window_bounds = array<i64: 128, 32>}, {pipeline_mode = #tpu.pipeline_mode<synchronous>, transform_indices = @transform_3, window_bounds = array<i64: 32, 128>}, {pipeline_mode = #tpu.pipeline_mode<synchronous>, transform_indices = @transform_4, window_bounds = array<i64: 2, 32, 128>}, {pipeline_mode = #tpu.pipeline_mode<synchronous>, transform_indices = @transform_5, window_bounds = array<i64: 2, 64, 96>}, {pipeline_mode = #tpu.pipeline_mode<synchronous>, transform_indices = @transform_6, window_bounds = array<i64: 2, 64, 32>}, {pipeline_mode = #tpu.pipeline_mode<synchronous>, transform_indices = @transform_7, window_bounds = array<i64: 2, 4, 64>}, {pipeline_mode = #tpu.pipeline_mode<synchronous>, transform_indices = @transform_8, window_bounds = array<i64: 2, 16, 64>}, {pipeline_mode = #tpu.pipeline_mode<synchronous>, transform_indices = @transform_9, window_bounds = array<i64: 2, 3, 64>}, {pipeline_mode = #tpu.pipeline_mode<synchronous>, transform_indices = @transform_10, window_bounds = array<i64: 3, 32>}, {pipeline_mode = #tpu.pipeline_mode<synchronous>, transform_indices = @transform_11, window_bounds = array<i64: 1, 128>}, {pipeline_mode = #tpu.pipeline_mode<synchronous>, transform_indices = @transform_12, window_bounds = array<i64: 2, 16, 64>}, {pipeline_mode = #tpu.pipeline_mode<synchronous>, transform_indices = @transform_13, window_bounds = array<i64: 2, 3, 64>}]} {
    %c0 = arith.constant 0 : index
    %0 = memref.load %arg1[%c0] : memref<1xi32, #tpu.memory_space<smem>>
    %1 = tpu.iota {dimensions = array<i32: 1>} : vector<1x128xi32>
    %2 = vector.broadcast %0 : i32 to vector<1x128xi32>
    %3 = arith.cmpi eq, %1, %2 : vector<1x128xi32>
    %4 = arith.extui %3 : vector<1x128xi1> to vector<1x128xi32>
    %5 = arith.sitofp %4 : vector<1x128xi32> to vector<1x128xf32>
    %c0_0 = arith.constant 0 : index
    %c0_1 = arith.constant 0 : index
    %6 = vector.load %arg4[%c0_0, %c0_1] : memref<128x32xf32, #tpu.memory_space<vmem>>, vector<128x32xf32>
    %cst = arith.constant dense<0.000000e+00> : vector<1x32xf32>
    %7 = tpu.matmul %5, %6, %cst {dimension_numbers = #tpu.dot_dimension_numbers<[1], [0], [0], [1], [0, 0, 1, 1], [], []>} : vector<1x128xf32>, vector<128x32xf32>, vector<1x32xf32> -> vector<1x32xf32>
    %c0_2 = arith.constant 0 : index
    %c0_3 = arith.constant 0 : index
    %8 = vector.load %arg12[%c0_2, %c0_3] : memref<3x32xf32, #tpu.memory_space<vmem>>, vector<3x32xf32>
    %9 = vector.extract_strided_slice %8 {offsets = [0, 0], sizes = [1, 32], strides = [1, 1]} : vector<3x32xf32> to vector<1x32xf32>
    %10 = arith.mulf %7, %7 : vector<1x32xf32>
    %cst_4 = arith.constant dense<0.000000e+00> : vector<1xf32>
    %11 = vector.multi_reduction <add>, %10, %cst_4 [1] : vector<1x32xf32> to vector<1xf32>
    %12 = vector.shape_cast %11 : vector<1xf32> to vector<1x1xf32>
    %cst_5 = arith.constant 3.200000e+01 : f32
    %13 = vector.broadcast %cst_5 : f32 to vector<1x1xf32>
    %14 = arith.divf %12, %13 : vector<1x1xf32>
    %cst_6 = arith.constant 9.99999974E-6 : f32
    %15 = vector.broadcast %cst_6 : f32 to vector<1x1xf32>
    %16 = arith.addf %14, %15 : vector<1x1xf32>
    %17 = math.rsqrt %16 : vector<1x1xf32>
    %18 = vector.broadcast %17 : vector<1x1xf32> to vector<1x32xf32>
    %19 = arith.mulf %7, %18 : vector<1x32xf32>
    %20 = arith.mulf %19, %9 : vector<1x32xf32>
    %c0_7 = arith.constant 0 : index
    %c0_8 = arith.constant 0 : index
    %c0_9 = arith.constant 0 : index
    %21 = vector.load %arg6[%c0_7, %c0_8, %c0_9] : memref<2x32x128xf32, #tpu.memory_space<vmem>>, vector<1x32x128xf32>
    %22 = vector.shape_cast %21 : vector<1x32x128xf32> to vector<32x128xf32>
    %cst_10 = arith.constant dense<0.000000e+00> : vector<1x128xf32>
    %23 = tpu.matmul %20, %22, %cst_10 {dimension_numbers = #tpu.dot_dimension_numbers<[1], [0], [0], [1], [0, 0, 1, 1], [], []>} : vector<1x32xf32>, vector<32x128xf32>, vector<1x128xf32> -> vector<1x128xf32>
    %24 = vector.extract_strided_slice %23 {offsets = [0, 0], sizes = [1, 64], strides = [1, 1]} : vector<1x128xf32> to vector<1x64xf32>
    %25 = vector.extract_strided_slice %23 {offsets = [0, 64], sizes = [1, 64], strides = [1, 1]} : vector<1x128xf32> to vector<1x64xf32>
    %c0_11 = arith.constant 0 : index
    %c0_12 = arith.constant 0 : index
    %c0_13 = arith.constant 0 : index
    %26 = vector.load %arg11[%c0_11, %c0_12, %c0_13] : memref<2x3x64xf32, #tpu.memory_space<vmem>>, vector<1x3x64xf32>
    %27 = vector.shape_cast %26 : vector<1x3x64xf32> to vector<3x64xf32>
    %c0_14 = arith.constant 0 : index
    %c0_15 = arith.constant 0 : index
    %c0_16 = arith.constant 0 : index
    %28 = vector.load %arg9[%c0_14, %c0_15, %c0_16] : memref<2x4x64xf32, #tpu.memory_space<vmem>>, vector<1x4x64xf32>
    %29 = vector.shape_cast %28 : vector<1x4x64xf32> to vector<4x64xf32>
    %c0_17 = arith.constant 0 : index
    %c0_18 = arith.constant 0 : index
    %c0_19 = arith.constant 0 : index
    %30 = vector.load %arg3[%c0_17, %c0_18, %c0_19] : memref<2x3x64xf32, #tpu.memory_space<vmem>>, vector<1x3x64xf32>
    %31 = vector.shape_cast %30 : vector<1x3x64xf32> to vector<3x64xf32>
    %32 = vector.extract_strided_slice %27 {offsets = [0, 0], sizes = [1, 64], strides = [1, 1]} : vector<3x64xf32> to vector<1x64xf32>
    %33 = vector.extract_strided_slice %29 {offsets = [3, 0], sizes = [1, 64], strides = [1, 1]} : vector<4x64xf32> to vector<1x64xf32>
    %34 = arith.mulf %33, %24 : vector<1x64xf32>
    %35 = arith.addf %32, %34 : vector<1x64xf32>
    %36 = vector.extract_strided_slice %29 {offsets = [0, 0], sizes = [1, 64], strides = [1, 1]} : vector<4x64xf32> to vector<1x64xf32>
    %37 = vector.extract_strided_slice %31 {offsets = [0, 0], sizes = [1, 64], strides = [1, 1]} : vector<3x64xf32> to vector<1x64xf32>
    %38 = arith.mulf %36, %37 : vector<1x64xf32>
    %39 = arith.addf %35, %38 : vector<1x64xf32>
    %40 = vector.extract_strided_slice %29 {offsets = [1, 0], sizes = [1, 64], strides = [1, 1]} : vector<4x64xf32> to vector<1x64xf32>
    %41 = vector.extract_strided_slice %31 {offsets = [1, 0], sizes = [1, 64], strides = [1, 1]} : vector<3x64xf32> to vector<1x64xf32>
    %42 = arith.mulf %40, %41 : vector<1x64xf32>
    %43 = arith.addf %39, %42 : vector<1x64xf32>
    %44 = vector.extract_strided_slice %29 {offsets = [2, 0], sizes = [1, 64], strides = [1, 1]} : vector<4x64xf32> to vector<1x64xf32>
    %45 = vector.extract_strided_slice %31 {offsets = [2, 0], sizes = [1, 64], strides = [1, 1]} : vector<3x64xf32> to vector<1x64xf32>
    %46 = arith.mulf %44, %45 : vector<1x64xf32>
    %47 = arith.addf %43, %46 : vector<1x64xf32>
    %cst_20 = arith.constant 0.000000e+00 : f32
    %48 = vector.broadcast %cst_20 : f32 to vector<1x64xf32>
    %49 = arith.subf %48, %47 : vector<1x64xf32>
    %50 = math.exp %49 : vector<1x64xf32>
    %cst_21 = arith.constant 1.000000e+00 : f32
    %51 = vector.broadcast %cst_21 : f32 to vector<1x64xf32>
    %52 = arith.addf %51, %50 : vector<1x64xf32>
    %cst_22 = arith.constant 1.000000e+00 : f32
    %53 = vector.broadcast %cst_22 : f32 to vector<1x64xf32>
    %54 = arith.divf %53, %52 : vector<1x64xf32>
    %55 = arith.mulf %47, %54 : vector<1x64xf32>
    %c0_23 = arith.constant 0 : index
    %c0_24 = arith.constant 0 : index
    %c0_25 = arith.constant 0 : index
    %56 = vector.load %arg7[%c0_23, %c0_24, %c0_25] : memref<2x64x96xf32, #tpu.memory_space<vmem>>, vector<1x64x96xf32>
    %57 = vector.shape_cast %56 : vector<1x64x96xf32> to vector<64x96xf32>
    %cst_26 = arith.constant dense<0.000000e+00> : vector<1x96xf32>
    %58 = tpu.matmul %55, %57, %cst_26 {dimension_numbers = #tpu.dot_dimension_numbers<[1], [0], [0], [1], [0, 0, 1, 1], [], []>} : vector<1x64xf32>, vector<64x96xf32>, vector<1x96xf32> -> vector<1x96xf32>
    %59 = vector.extract_strided_slice %58 {offsets = [0, 0], sizes = [1, 64], strides = [1, 1]} : vector<1x96xf32> to vector<1x64xf32>
    %60 = vector.extract_strided_slice %27 {offsets = [1, 0], sizes = [1, 64], strides = [1, 1]} : vector<3x64xf32> to vector<1x64xf32>
    %61 = arith.addf %59, %60 : vector<1x64xf32>
    %cst_27 = arith.constant 0.000000e+00 : f32
    %62 = vector.broadcast %cst_27 : f32 to vector<1x64xf32>
    %63 = arith.maximumf %61, %62 : vector<1x64xf32>
    %64 = math.absf %61 : vector<1x64xf32>
    %cst_28 = arith.constant 0.000000e+00 : f32
    %65 = vector.broadcast %cst_28 : f32 to vector<1x64xf32>
    %66 = arith.subf %65, %64 : vector<1x64xf32>
    %67 = math.exp %66 : vector<1x64xf32>
    %68 = math.log1p %67 : vector<1x64xf32>
    %69 = arith.addf %63, %68 : vector<1x64xf32>
    %70 = vector.extract_strided_slice %58 {offsets = [0, 64], sizes = [1, 16], strides = [1, 1]} : vector<1x96xf32> to vector<1x16xf32>
    %71 = vector.extract_strided_slice %58 {offsets = [0, 80], sizes = [1, 16], strides = [1, 1]} : vector<1x96xf32> to vector<1x16xf32>
    %c0_29 = arith.constant 0 : index
    %c0_30 = arith.constant 0 : index
    %c0_31 = arith.constant 0 : index
    %72 = vector.load %arg10[%c0_29, %c0_30, %c0_31] : memref<2x16x64xf32, #tpu.memory_space<vmem>>, vector<1x16x64xf32>
    %73 = vector.shape_cast %72 : vector<1x16x64xf32> to vector<16x64xf32>
    %74 = vector.broadcast %69 : vector<1x64xf32> to vector<16x64xf32>
    %75 = arith.mulf %74, %73 : vector<16x64xf32>
    %76 = math.exp %75 : vector<16x64xf32>
    %77 = arith.mulf %69, %55 : vector<1x64xf32>
    %78 = vector.shape_cast %70 : vector<1x16xf32> to vector<1x16x1xf32>
    %79 = vector.shape_cast %77 : vector<1x64xf32> to vector<1x1x64xf32>
    %80 = vector.broadcast %78 : vector<1x16x1xf32> to vector<1x16x64xf32>
    %81 = vector.broadcast %79 : vector<1x1x64xf32> to vector<1x16x64xf32>
    %82 = arith.mulf %80, %81 : vector<1x16x64xf32>
    %83 = vector.shape_cast %82 : vector<1x16x64xf32> to vector<16x64xf32>
    %c0_32 = arith.constant 0 : index
    %c0_33 = arith.constant 0 : index
    %c0_34 = arith.constant 0 : index
    %84 = vector.load %arg2[%c0_32, %c0_33, %c0_34] : memref<2x16x64xf32, #tpu.memory_space<vmem>>, vector<1x16x64xf32>
    %85 = vector.shape_cast %84 : vector<1x16x64xf32> to vector<16x64xf32>
    %86 = arith.mulf %76, %85 : vector<16x64xf32>
    %87 = arith.addf %86, %83 : vector<16x64xf32>
    %cst_35 = arith.constant dense<0.000000e+00> : vector<1x64xf32>
    %88 = tpu.matmul %71, %87, %cst_35 {dimension_numbers = #tpu.dot_dimension_numbers<[1], [0], [0], [1], [0, 0, 1, 1], [], []>} : vector<1x16xf32>, vector<16x64xf32>, vector<1x64xf32> -> vector<1x64xf32>
    %89 = vector.extract_strided_slice %27 {offsets = [2, 0], sizes = [1, 64], strides = [1, 1]} : vector<3x64xf32> to vector<1x64xf32>
    %90 = arith.mulf %89, %55 : vector<1x64xf32>
    %91 = arith.addf %88, %90 : vector<1x64xf32>
    %cst_36 = arith.constant 0.000000e+00 : f32
    %92 = vector.broadcast %cst_36 : f32 to vector<1x64xf32>
    %93 = arith.subf %92, %25 : vector<1x64xf32>
    %94 = math.exp %93 : vector<1x64xf32>
    %cst_37 = arith.constant 1.000000e+00 : f32
    %95 = vector.broadcast %cst_37 : f32 to vector<1x64xf32>
    %96 = arith.addf %95, %94 : vector<1x64xf32>
    %cst_38 = arith.constant 1.000000e+00 : f32
    %97 = vector.broadcast %cst_38 : f32 to vector<1x64xf32>
    %98 = arith.divf %97, %96 : vector<1x64xf32>
    %99 = arith.mulf %25, %98 : vector<1x64xf32>
    %100 = arith.mulf %91, %99 : vector<1x64xf32>
    %c0_39 = arith.constant 0 : index
    %c0_40 = arith.constant 0 : index
    %c0_41 = arith.constant 0 : index
    %101 = vector.load %arg8[%c0_39, %c0_40, %c0_41] : memref<2x64x32xf32, #tpu.memory_space<vmem>>, vector<1x64x32xf32>
    %102 = vector.shape_cast %101 : vector<1x64x32xf32> to vector<64x32xf32>
    %cst_42 = arith.constant dense<0.000000e+00> : vector<1x32xf32>
    %103 = tpu.matmul %100, %102, %cst_42 {dimension_numbers = #tpu.dot_dimension_numbers<[1], [0], [0], [1], [0, 0, 1, 1], [], []>} : vector<1x64xf32>, vector<64x32xf32>, vector<1x32xf32> -> vector<1x32xf32>
    %104 = arith.addf %7, %103 : vector<1x32xf32>
    %c0_43 = arith.constant 0 : index
    %c0_44 = arith.constant 0 : index
    %c0_45 = arith.constant 0 : index
    %105 = vector.load %arg14[%c0_43, %c0_44, %c0_45] : memref<2x16x64xf32, #tpu.memory_space<vmem>>, vector<1x16x64xf32>
    %106 = vector.shape_cast %105 : vector<1x16x64xf32> to vector<16x64xf32>
    %107 = vector.shape_cast %87 : vector<16x64xf32> to vector<1x16x64xf32>
    tpu.vector_store %arg14[%c0_43, %c0_44, %c0_45], %107 {strides = array<i32>} : memref<2x16x64xf32, #tpu.memory_space<vmem>>, vector<1x16x64xf32>,
    %108 = vector.extract_strided_slice %31 {offsets = [1, 0], sizes = [1, 64], strides = [1, 1]} : vector<3x64xf32> to vector<1x64xf32>
    %c0_46 = arith.constant 0 : index
    %c0_47 = arith.constant 0 : index
    %c0_48 = arith.constant 0 : index
    %109 = vector.load %arg15[%c0_46, %c0_47, %c0_48] : memref<2x3x64xf32, #tpu.memory_space<vmem>>, vector<1x1x64xf32>
    %110 = vector.shape_cast %109 : vector<1x1x64xf32> to vector<1x64xf32>
    %111 = vector.shape_cast %108 : vector<1x64xf32> to vector<1x1x64xf32>
    tpu.vector_store %arg15[%c0_46, %c0_47, %c0_48], %111 {strides = array<i32>} : memref<2x3x64xf32, #tpu.memory_space<vmem>>, vector<1x1x64xf32>,
    %112 = vector.extract_strided_slice %31 {offsets = [2, 0], sizes = [1, 64], strides = [1, 1]} : vector<3x64xf32> to vector<1x64xf32>
    %c0_49 = arith.constant 0 : index
    %c1 = arith.constant 1 : index
    %c0_50 = arith.constant 0 : index
    %113 = vector.load %arg15[%c0_49, %c1, %c0_50] : memref<2x3x64xf32, #tpu.memory_space<vmem>>, vector<1x1x64xf32>
    %114 = vector.shape_cast %113 : vector<1x1x64xf32> to vector<1x64xf32>
    %115 = vector.shape_cast %112 : vector<1x64xf32> to vector<1x1x64xf32>
    tpu.vector_store %arg15[%c0_49, %c1, %c0_50], %115 {strides = array<i32>} : memref<2x3x64xf32, #tpu.memory_space<vmem>>, vector<1x1x64xf32>,
    %c0_51 = arith.constant 0 : index
    %c2 = arith.constant 2 : index
    %c0_52 = arith.constant 0 : index
    %116 = vector.load %arg15[%c0_51, %c2, %c0_52] : memref<2x3x64xf32, #tpu.memory_space<vmem>>, vector<1x1x64xf32>
    %117 = vector.shape_cast %116 : vector<1x1x64xf32> to vector<1x64xf32>
    %118 = vector.shape_cast %24 : vector<1x64xf32> to vector<1x1x64xf32>
    tpu.vector_store %arg15[%c0_51, %c2, %c0_52], %118 {strides = array<i32>} : memref<2x3x64xf32, #tpu.memory_space<vmem>>, vector<1x1x64xf32>,
    %119 = vector.extract_strided_slice %8 {offsets = [1, 0], sizes = [1, 32], strides = [1, 1]} : vector<3x32xf32> to vector<1x32xf32>
    %120 = arith.mulf %104, %104 : vector<1x32xf32>
    %cst_53 = arith.constant dense<0.000000e+00> : vector<1xf32>
    %121 = vector.multi_reduction <add>, %120, %cst_53 [1] : vector<1x32xf32> to vector<1xf32>
    %122 = vector.shape_cast %121 : vector<1xf32> to vector<1x1xf32>
    %cst_54 = arith.constant 3.200000e+01 : f32
    %123 = vector.broadcast %cst_54 : f32 to vector<1x1xf32>
    %124 = arith.divf %122, %123 : vector<1x1xf32>
    %cst_55 = arith.constant 9.99999974E-6 : f32
    %125 = vector.broadcast %cst_55 : f32 to vector<1x1xf32>
    %126 = arith.addf %124, %125 : vector<1x1xf32>
    %127 = math.rsqrt %126 : vector<1x1xf32>
    %128 = vector.broadcast %127 : vector<1x1xf32> to vector<1x32xf32>
    %129 = arith.mulf %104, %128 : vector<1x32xf32>
    %130 = arith.mulf %129, %119 : vector<1x32xf32>
    %c1_56 = arith.constant 1 : index
    %c0_57 = arith.constant 0 : index
    %c0_58 = arith.constant 0 : index
    %131 = vector.load %arg6[%c1_56, %c0_57, %c0_58] : memref<2x32x128xf32, #tpu.memory_space<vmem>>, vector<1x32x128xf32>
    %132 = vector.shape_cast %131 : vector<1x32x128xf32> to vector<32x128xf32>
    %cst_59 = arith.constant dense<0.000000e+00> : vector<1x128xf32>
    %133 = tpu.matmul %130, %132, %cst_59 {dimension_numbers = #tpu.dot_dimension_numbers<[1], [0], [0], [1], [0, 0, 1, 1], [], []>} : vector<1x32xf32>, vector<32x128xf32>, vector<1x128xf32> -> vector<1x128xf32>
    %134 = vector.extract_strided_slice %133 {offsets = [0, 0], sizes = [1, 64], strides = [1, 1]} : vector<1x128xf32> to vector<1x64xf32>
    %135 = vector.extract_strided_slice %133 {offsets = [0, 64], sizes = [1, 64], strides = [1, 1]} : vector<1x128xf32> to vector<1x64xf32>
    %c1_60 = arith.constant 1 : index
    %c0_61 = arith.constant 0 : index
    %c0_62 = arith.constant 0 : index
    %136 = vector.load %arg11[%c1_60, %c0_61, %c0_62] : memref<2x3x64xf32, #tpu.memory_space<vmem>>, vector<1x3x64xf32>
    %137 = vector.shape_cast %136 : vector<1x3x64xf32> to vector<3x64xf32>
    %c1_63 = arith.constant 1 : index
    %c0_64 = arith.constant 0 : index
    %c0_65 = arith.constant 0 : index
    %138 = vector.load %arg9[%c1_63, %c0_64, %c0_65] : memref<2x4x64xf32, #tpu.memory_space<vmem>>, vector<1x4x64xf32>
    %139 = vector.shape_cast %138 : vector<1x4x64xf32> to vector<4x64xf32>
    %c1_66 = arith.constant 1 : index
    %c0_67 = arith.constant 0 : index
    %c0_68 = arith.constant 0 : index
    %140 = vector.load %arg3[%c1_66, %c0_67, %c0_68] : memref<2x3x64xf32, #tpu.memory_space<vmem>>, vector<1x3x64xf32>
    %141 = vector.shape_cast %140 : vector<1x3x64xf32> to vector<3x64xf32>
    %142 = vector.extract_strided_slice %137 {offsets = [0, 0], sizes = [1, 64], strides = [1, 1]} : vector<3x64xf32> to vector<1x64xf32>
    %143 = vector.extract_strided_slice %139 {offsets = [3, 0], sizes = [1, 64], strides = [1, 1]} : vector<4x64xf32> to vector<1x64xf32>
    %144 = arith.mulf %143, %134 : vector<1x64xf32>
    %145 = arith.addf %142, %144 : vector<1x64xf32>
    %146 = vector.extract_strided_slice %139 {offsets = [0, 0], sizes = [1, 64], strides = [1, 1]} : vector<4x64xf32> to vector<1x64xf32>
    %147 = vector.extract_strided_slice %141 {offsets = [0, 0], sizes = [1, 64], strides = [1, 1]} : vector<3x64xf32> to vector<1x64xf32>
    %148 = arith.mulf %146, %147 : vector<1x64xf32>
    %149 = arith.addf %145, %148 : vector<1x64xf32>
    %150 = vector.extract_strided_slice %139 {offsets = [1, 0], sizes = [1, 64], strides = [1, 1]} : vector<4x64xf32> to vector<1x64xf32>
    %151 = vector.extract_strided_slice %141 {offsets = [1, 0], sizes = [1, 64], strides = [1, 1]} : vector<3x64xf32> to vector<1x64xf32>
    %152 = arith.mulf %150, %151 : vector<1x64xf32>
    %153 = arith.addf %149, %152 : vector<1x64xf32>
    %154 = vector.extract_strided_slice %139 {offsets = [2, 0], sizes = [1, 64], strides = [1, 1]} : vector<4x64xf32> to vector<1x64xf32>
    %155 = vector.extract_strided_slice %141 {offsets = [2, 0], sizes = [1, 64], strides = [1, 1]} : vector<3x64xf32> to vector<1x64xf32>
    %156 = arith.mulf %154, %155 : vector<1x64xf32>
    %157 = arith.addf %153, %156 : vector<1x64xf32>
    %cst_69 = arith.constant 0.000000e+00 : f32
    %158 = vector.broadcast %cst_69 : f32 to vector<1x64xf32>
    %159 = arith.subf %158, %157 : vector<1x64xf32>
    %160 = math.exp %159 : vector<1x64xf32>
    %cst_70 = arith.constant 1.000000e+00 : f32
    %161 = vector.broadcast %cst_70 : f32 to vector<1x64xf32>
    %162 = arith.addf %161, %160 : vector<1x64xf32>
    %cst_71 = arith.constant 1.000000e+00 : f32
    %163 = vector.broadcast %cst_71 : f32 to vector<1x64xf32>
    %164 = arith.divf %163, %162 : vector<1x64xf32>
    %165 = arith.mulf %157, %164 : vector<1x64xf32>
    %c1_72 = arith.constant 1 : index
    %c0_73 = arith.constant 0 : index
    %c0_74 = arith.constant 0 : index
    %166 = vector.load %arg7[%c1_72, %c0_73, %c0_74] : memref<2x64x96xf32, #tpu.memory_space<vmem>>, vector<1x64x96xf32>
    %167 = vector.shape_cast %166 : vector<1x64x96xf32> to vector<64x96xf32>
    %cst_75 = arith.constant dense<0.000000e+00> : vector<1x96xf32>
    %168 = tpu.matmul %165, %167, %cst_75 {dimension_numbers = #tpu.dot_dimension_numbers<[1], [0], [0], [1], [0, 0, 1, 1], [], []>} : vector<1x64xf32>, vector<64x96xf32>, vector<1x96xf32> -> vector<1x96xf32>
    %169 = vector.extract_strided_slice %168 {offsets = [0, 0], sizes = [1, 64], strides = [1, 1]} : vector<1x96xf32> to vector<1x64xf32>
    %170 = vector.extract_strided_slice %137 {offsets = [1, 0], sizes = [1, 64], strides = [1, 1]} : vector<3x64xf32> to vector<1x64xf32>
    %171 = arith.addf %169, %170 : vector<1x64xf32>
    %cst_76 = arith.constant 0.000000e+00 : f32
    %172 = vector.broadcast %cst_76 : f32 to vector<1x64xf32>
    %173 = arith.maximumf %171, %172 : vector<1x64xf32>
    %174 = math.absf %171 : vector<1x64xf32>
    %cst_77 = arith.constant 0.000000e+00 : f32
    %175 = vector.broadcast %cst_77 : f32 to vector<1x64xf32>
    %176 = arith.subf %175, %174 : vector<1x64xf32>
    %177 = math.exp %176 : vector<1x64xf32>
    %178 = math.log1p %177 : vector<1x64xf32>
    %179 = arith.addf %173, %178 : vector<1x64xf32>
    %180 = vector.extract_strided_slice %168 {offsets = [0, 64], sizes = [1, 16], strides = [1, 1]} : vector<1x96xf32> to vector<1x16xf32>
    %181 = vector.extract_strided_slice %168 {offsets = [0, 80], sizes = [1, 16], strides = [1, 1]} : vector<1x96xf32> to vector<1x16xf32>
    %c1_78 = arith.constant 1 : index
    %c0_79 = arith.constant 0 : index
    %c0_80 = arith.constant 0 : index
    %182 = vector.load %arg10[%c1_78, %c0_79, %c0_80] : memref<2x16x64xf32, #tpu.memory_space<vmem>>, vector<1x16x64xf32>
    %183 = vector.shape_cast %182 : vector<1x16x64xf32> to vector<16x64xf32>
    %184 = vector.broadcast %179 : vector<1x64xf32> to vector<16x64xf32>
    %185 = arith.mulf %184, %183 : vector<16x64xf32>
    %186 = math.exp %185 : vector<16x64xf32>
    %187 = arith.mulf %179, %165 : vector<1x64xf32>
    %188 = vector.shape_cast %180 : vector<1x16xf32> to vector<1x16x1xf32>
    %189 = vector.shape_cast %187 : vector<1x64xf32> to vector<1x1x64xf32>
    %190 = vector.broadcast %188 : vector<1x16x1xf32> to vector<1x16x64xf32>
    %191 = vector.broadcast %189 : vector<1x1x64xf32> to vector<1x16x64xf32>
    %192 = arith.mulf %190, %191 : vector<1x16x64xf32>
    %193 = vector.shape_cast %192 : vector<1x16x64xf32> to vector<16x64xf32>
    %c1_81 = arith.constant 1 : index
    %c0_82 = arith.constant 0 : index
    %c0_83 = arith.constant 0 : index
    %194 = vector.load %arg2[%c1_81, %c0_82, %c0_83] : memref<2x16x64xf32, #tpu.memory_space<vmem>>, vector<1x16x64xf32>
    %195 = vector.shape_cast %194 : vector<1x16x64xf32> to vector<16x64xf32>
    %196 = arith.mulf %186, %195 : vector<16x64xf32>
    %197 = arith.addf %196, %193 : vector<16x64xf32>
    %cst_84 = arith.constant dense<0.000000e+00> : vector<1x64xf32>
    %198 = tpu.matmul %181, %197, %cst_84 {dimension_numbers = #tpu.dot_dimension_numbers<[1], [0], [0], [1], [0, 0, 1, 1], [], []>} : vector<1x16xf32>, vector<16x64xf32>, vector<1x64xf32> -> vector<1x64xf32>
    %199 = vector.extract_strided_slice %137 {offsets = [2, 0], sizes = [1, 64], strides = [1, 1]} : vector<3x64xf32> to vector<1x64xf32>
    %200 = arith.mulf %199, %165 : vector<1x64xf32>
    %201 = arith.addf %198, %200 : vector<1x64xf32>
    %cst_85 = arith.constant 0.000000e+00 : f32
    %202 = vector.broadcast %cst_85 : f32 to vector<1x64xf32>
    %203 = arith.subf %202, %135 : vector<1x64xf32>
    %204 = math.exp %203 : vector<1x64xf32>
    %cst_86 = arith.constant 1.000000e+00 : f32
    %205 = vector.broadcast %cst_86 : f32 to vector<1x64xf32>
    %206 = arith.addf %205, %204 : vector<1x64xf32>
    %cst_87 = arith.constant 1.000000e+00 : f32
    %207 = vector.broadcast %cst_87 : f32 to vector<1x64xf32>
    %208 = arith.divf %207, %206 : vector<1x64xf32>
    %209 = arith.mulf %135, %208 : vector<1x64xf32>
    %210 = arith.mulf %201, %209 : vector<1x64xf32>
    %c1_88 = arith.constant 1 : index
    %c0_89 = arith.constant 0 : index
    %c0_90 = arith.constant 0 : index
    %211 = vector.load %arg8[%c1_88, %c0_89, %c0_90] : memref<2x64x32xf32, #tpu.memory_space<vmem>>, vector<1x64x32xf32>
    %212 = vector.shape_cast %211 : vector<1x64x32xf32> to vector<64x32xf32>
    %cst_91 = arith.constant dense<0.000000e+00> : vector<1x32xf32>
    %213 = tpu.matmul %210, %212, %cst_91 {dimension_numbers = #tpu.dot_dimension_numbers<[1], [0], [0], [1], [0, 0, 1, 1], [], []>} : vector<1x64xf32>, vector<64x32xf32>, vector<1x32xf32> -> vector<1x32xf32>
    %214 = arith.addf %104, %213 : vector<1x32xf32>
    %c1_92 = arith.constant 1 : index
    %c0_93 = arith.constant 0 : index
    %c0_94 = arith.constant 0 : index
    %215 = vector.load %arg14[%c1_92, %c0_93, %c0_94] : memref<2x16x64xf32, #tpu.memory_space<vmem>>, vector<1x16x64xf32>
    %216 = vector.shape_cast %215 : vector<1x16x64xf32> to vector<16x64xf32>
    %217 = vector.shape_cast %197 : vector<16x64xf32> to vector<1x16x64xf32>
    tpu.vector_store %arg14[%c1_92, %c0_93, %c0_94], %217 {strides = array<i32>} : memref<2x16x64xf32, #tpu.memory_space<vmem>>, vector<1x16x64xf32>,
    %218 = vector.extract_strided_slice %141 {offsets = [1, 0], sizes = [1, 64], strides = [1, 1]} : vector<3x64xf32> to vector<1x64xf32>
    %c1_95 = arith.constant 1 : index
    %c0_96 = arith.constant 0 : index
    %c0_97 = arith.constant 0 : index
    %219 = vector.load %arg15[%c1_95, %c0_96, %c0_97] : memref<2x3x64xf32, #tpu.memory_space<vmem>>, vector<1x1x64xf32>
    %220 = vector.shape_cast %219 : vector<1x1x64xf32> to vector<1x64xf32>
    %221 = vector.shape_cast %218 : vector<1x64xf32> to vector<1x1x64xf32>
    tpu.vector_store %arg15[%c1_95, %c0_96, %c0_97], %221 {strides = array<i32>} : memref<2x3x64xf32, #tpu.memory_space<vmem>>, vector<1x1x64xf32>,
    %222 = vector.extract_strided_slice %141 {offsets = [2, 0], sizes = [1, 64], strides = [1, 1]} : vector<3x64xf32> to vector<1x64xf32>
    %c1_98 = arith.constant 1 : index
    %c1_99 = arith.constant 1 : index
    %c0_100 = arith.constant 0 : index
    %223 = vector.load %arg15[%c1_98, %c1_99, %c0_100] : memref<2x3x64xf32, #tpu.memory_space<vmem>>, vector<1x1x64xf32>
    %224 = vector.shape_cast %223 : vector<1x1x64xf32> to vector<1x64xf32>
    %225 = vector.shape_cast %222 : vector<1x64xf32> to vector<1x1x64xf32>
    tpu.vector_store %arg15[%c1_98, %c1_99, %c0_100], %225 {strides = array<i32>} : memref<2x3x64xf32, #tpu.memory_space<vmem>>, vector<1x1x64xf32>,
    %c1_101 = arith.constant 1 : index
    %c2_102 = arith.constant 2 : index
    %c0_103 = arith.constant 0 : index
    %226 = vector.load %arg15[%c1_101, %c2_102, %c0_103] : memref<2x3x64xf32, #tpu.memory_space<vmem>>, vector<1x1x64xf32>
    %227 = vector.shape_cast %226 : vector<1x1x64xf32> to vector<1x64xf32>
    %228 = vector.shape_cast %134 : vector<1x64xf32> to vector<1x1x64xf32>
    tpu.vector_store %arg15[%c1_101, %c2_102, %c0_103], %228 {strides = array<i32>} : memref<2x3x64xf32, #tpu.memory_space<vmem>>, vector<1x1x64xf32>,
    %229 = vector.extract_strided_slice %8 {offsets = [2, 0], sizes = [1, 32], strides = [1, 1]} : vector<3x32xf32> to vector<1x32xf32>
    %230 = arith.mulf %214, %214 : vector<1x32xf32>
    %cst_104 = arith.constant dense<0.000000e+00> : vector<1xf32>
    %231 = vector.multi_reduction <add>, %230, %cst_104 [1] : vector<1x32xf32> to vector<1xf32>
    %232 = vector.shape_cast %231 : vector<1xf32> to vector<1x1xf32>
    %cst_105 = arith.constant 3.200000e+01 : f32
    %233 = vector.broadcast %cst_105 : f32 to vector<1x1xf32>
    %234 = arith.divf %232, %233 : vector<1x1xf32>
    %cst_106 = arith.constant 9.99999974E-6 : f32
    %235 = vector.broadcast %cst_106 : f32 to vector<1x1xf32>
    %236 = arith.addf %234, %235 : vector<1x1xf32>
    %237 = math.rsqrt %236 : vector<1x1xf32>
    %238 = vector.broadcast %237 : vector<1x1xf32> to vector<1x32xf32>
    %239 = arith.mulf %214, %238 : vector<1x32xf32>
    %240 = arith.mulf %239, %229 : vector<1x32xf32>
    %c0_107 = arith.constant 0 : index
    %c0_108 = arith.constant 0 : index
    %241 = vector.load %arg5[%c0_107, %c0_108] : memref<32x128xf32, #tpu.memory_space<vmem>>, vector<32x128xf32>
    %cst_109 = arith.constant dense<0.000000e+00> : vector<1x128xf32>
    %242 = tpu.matmul %240, %241, %cst_109 {dimension_numbers = #tpu.dot_dimension_numbers<[1], [0], [0], [1], [0, 0, 1, 1], [], []>} : vector<1x32xf32>, vector<32x128xf32>, vector<1x128xf32> -> vector<1x128xf32>
    %c0_110 = arith.constant 0 : index
    %c0_111 = arith.constant 0 : index
    %243 = vector.load %arg13[%c0_110, %c0_111] : memref<1x128xf32, #tpu.memory_space<vmem>>, vector<1x128xf32>
    tpu.vector_store %arg13[%c0_110, %c0_111], %242 {strides = array<i32>} : memref<1x128xf32, #tpu.memory_space<vmem>>, vector<1x128xf32>,
    return
  }
  func.func @transform_0(%arg0: i32, %arg1: memref<1xi32, #tpu.memory_space<smem>>) -> (i32, i32, i32) {
    %c0_i32 = arith.constant 0 : i32
    %c0_i32_0 = arith.constant 0 : i32
    %c0_i32_1 = arith.constant 0 : i32
    %c0_i32_2 = arith.constant 0 : i32
    return %c0_i32, %c0_i32_0, %c0_i32_1 : i32, i32, i32
  }
  func.func @transform_1(%arg0: i32, %arg1: memref<1xi32, #tpu.memory_space<smem>>) -> (i32, i32, i32) {
    %c0_i32 = arith.constant 0 : i32
    %c0_i32_0 = arith.constant 0 : i32
    %c0_i32_1 = arith.constant 0 : i32
    %c0_i32_2 = arith.constant 0 : i32
    return %c0_i32, %c0_i32_0, %c0_i32_1 : i32, i32, i32
  }
  func.func @transform_2(%arg0: i32, %arg1: memref<1xi32, #tpu.memory_space<smem>>) -> (i32, i32) {
    %c0_i32 = arith.constant 0 : i32
    %c0_i32_0 = arith.constant 0 : i32
    %c0_i32_1 = arith.constant 0 : i32
    return %c0_i32, %c0_i32_0 : i32, i32
  }
  func.func @transform_3(%arg0: i32, %arg1: memref<1xi32, #tpu.memory_space<smem>>) -> (i32, i32) {
    %c0_i32 = arith.constant 0 : i32
    %c0_i32_0 = arith.constant 0 : i32
    %c0_i32_1 = arith.constant 0 : i32
    return %c0_i32, %c0_i32_0 : i32, i32
  }
  func.func @transform_4(%arg0: i32, %arg1: memref<1xi32, #tpu.memory_space<smem>>) -> (i32, i32, i32) {
    %c0_i32 = arith.constant 0 : i32
    %c0_i32_0 = arith.constant 0 : i32
    %c0_i32_1 = arith.constant 0 : i32
    %c0_i32_2 = arith.constant 0 : i32
    return %c0_i32, %c0_i32_0, %c0_i32_1 : i32, i32, i32
  }
  func.func @transform_5(%arg0: i32, %arg1: memref<1xi32, #tpu.memory_space<smem>>) -> (i32, i32, i32) {
    %c0_i32 = arith.constant 0 : i32
    %c0_i32_0 = arith.constant 0 : i32
    %c0_i32_1 = arith.constant 0 : i32
    %c0_i32_2 = arith.constant 0 : i32
    return %c0_i32, %c0_i32_0, %c0_i32_1 : i32, i32, i32
  }
  func.func @transform_6(%arg0: i32, %arg1: memref<1xi32, #tpu.memory_space<smem>>) -> (i32, i32, i32) {
    %c0_i32 = arith.constant 0 : i32
    %c0_i32_0 = arith.constant 0 : i32
    %c0_i32_1 = arith.constant 0 : i32
    %c0_i32_2 = arith.constant 0 : i32
    return %c0_i32, %c0_i32_0, %c0_i32_1 : i32, i32, i32
  }
  func.func @transform_7(%arg0: i32, %arg1: memref<1xi32, #tpu.memory_space<smem>>) -> (i32, i32, i32) {
    %c0_i32 = arith.constant 0 : i32
    %c0_i32_0 = arith.constant 0 : i32
    %c0_i32_1 = arith.constant 0 : i32
    %c0_i32_2 = arith.constant 0 : i32
    return %c0_i32, %c0_i32_0, %c0_i32_1 : i32, i32, i32
  }
  func.func @transform_8(%arg0: i32, %arg1: memref<1xi32, #tpu.memory_space<smem>>) -> (i32, i32, i32) {
    %c0_i32 = arith.constant 0 : i32
    %c0_i32_0 = arith.constant 0 : i32
    %c0_i32_1 = arith.constant 0 : i32
    %c0_i32_2 = arith.constant 0 : i32
    return %c0_i32, %c0_i32_0, %c0_i32_1 : i32, i32, i32
  }
  func.func @transform_9(%arg0: i32, %arg1: memref<1xi32, #tpu.memory_space<smem>>) -> (i32, i32, i32) {
    %c0_i32 = arith.constant 0 : i32
    %c0_i32_0 = arith.constant 0 : i32
    %c0_i32_1 = arith.constant 0 : i32
    %c0_i32_2 = arith.constant 0 : i32
    return %c0_i32, %c0_i32_0, %c0_i32_1 : i32, i32, i32
  }
  func.func @transform_10(%arg0: i32, %arg1: memref<1xi32, #tpu.memory_space<smem>>) -> (i32, i32) {
    %c0_i32 = arith.constant 0 : i32
    %c0_i32_0 = arith.constant 0 : i32
    %c0_i32_1 = arith.constant 0 : i32
    return %c0_i32, %c0_i32_0 : i32, i32
  }
  func.func @transform_11(%arg0: i32, %arg1: memref<1xi32, #tpu.memory_space<smem>>) -> (i32, i32) {
    %c0_i32 = arith.constant 0 : i32
    %c0_i32_0 = arith.constant 0 : i32
    %c0_i32_1 = arith.constant 0 : i32
    return %c0_i32, %c0_i32_0 : i32, i32
  }
  func.func @transform_12(%arg0: i32, %arg1: memref<1xi32, #tpu.memory_space<smem>>) -> (i32, i32, i32) {
    %c0_i32 = arith.constant 0 : i32
    %c0_i32_0 = arith.constant 0 : i32
    %c0_i32_1 = arith.constant 0 : i32
    %c0_i32_2 = arith.constant 0 : i32
    return %c0_i32, %c0_i32_0, %c0_i32_1 : i32, i32, i32
  }
  func.func @transform_13(%arg0: i32, %arg1: memref<1xi32, #tpu.memory_space<smem>>) -> (i32, i32, i32) {
    %c0_i32 = arith.constant 0 : i32
    %c0_i32_0 = arith.constant 0 : i32
    %c0_i32_1 = arith.constant 0 : i32
    %c0_i32_2 = arith.constant 0 : i32
    return %c0_i32, %c0_i32_0, %c0_i32_1 : i32, i32, i32
  }
}

</mosaic_0001>

<bundles_post_ra>
// kernel: tpu_custom_call.1
= control target key start
LH: loop header
LB: loop body
LE: loop exit
PB: predicated region body
PF: predicated region fallthrough
CT: control target
= control target key end

     0   :  { %v1570_v3 = vmov 0.0|0.0   ;;  %vm1571_vm0 = vmmov 0   ;;  %v1572_v6 = vmov 0.0   ;;  %s2047_s0 = inlined_call_operand.<no memory space> [shape: s32[1], index: 0, kind: input, shape index: {}]   ;;  %s2048_s1 = inlined_call_operand.vmem [shape: f32[2,16,64], index: 1, kind: input, shape index: {}, may-alias: {1,13}]   ;;  %s2049_s2 = inlined_call_operand.vmem [shape: f32[2,3,64], index: 2, kind: input, shape index: {}, may-alias: {2,14}]   ;;  %s2050_s3 = inlined_call_operand.vmem [shape: f32[128,32], index: 3, kind: input, shape index: {}]   ;;  %s2051_s4 = inlined_call_operand.vmem [shape: f32[32,128], index: 4, kind: input, shape index: {}]   ;;  %s2052_s5 = inlined_call_operand.vmem [shape: f32[2,32,128], index: 5, kind: input, shape index: {}]   ;;  %s2053_s6 = inlined_call_operand.vmem [shape: f32[2,64,96], index: 6, kind: input, shape index: {}]   ;;  %s2054_s7 = inlined_call_operand.vmem [shape: f32[2,64,32], index: 7, kind: input, shape index: {}]   ;;  %s2055_s8 = inlined_call_operand.vmem [shape: f32[2,4,64], index: 8, kind: input, shape index: {}]   ;;  %s2056_s9 = inlined_call_operand.vmem [shape: f32[2,16,64], index: 9, kind: input, shape index: {}]   ;;  %s2057_s10 = inlined_call_operand.vmem [shape: f32[2,3,64], index: 10, kind: input, shape index: {}]   ;;  %s2058_s11 = inlined_call_operand.vmem [shape: f32[3,32], index: 11, kind: input, shape index: {}]   ;;  %s2059_s12 = inlined_call_operand.hbm [shape: f32[1,128], index: 12, kind: output, shape index: {0}]   ;;  %s2060_s13 = inlined_call_operand.vmem [shape: f32[2,16,64], index: 13, kind: output, shape index: {1}, may-alias: {1,13}]   ;;  %s2061_s14 = inlined_call_operand.vmem [shape: f32[2,3,64], index: 14, kind: output, shape index: {2}, may-alias: {2,14}]  }
   0x1   :  { %v51_v0 = vld [vmem:[%s2050_s3] sm:$0xff]  ;;  %v52_v1 = vld [vmem:[%s2050_s3 + $0x8] sm:$0xff]  ;;  %v53_v2 = vld [vmem:[%s2050_s3 + $0x10] sm:$0xff]  ;;  %1405 = vmatprep.subr.bf16.mxu0 %v1570_v3  ;;  %1279 = vmatprep.mubr.msk.f32.mxu0 %vm1571_vm0, %v1572_v6 }
   0x2   :  { %v1406_v4 = vpack.c.bf16 %v52_v1, %v51_v0  ;;  %v54_v5 = vld [vmem:[%s2050_s3 + $0x18] sm:$0xff]  ;;  %1429 = vmatprep.subr.bf16.mxu1 %v1570_v3  ;;  %1290 = vmatprep.mubr.msk.f32.mxu1 %vm1571_vm0, %v1572_v6  ;;  %v55_v8 = vld [vmem:[%s2050_s3 + $0x20] sm:$0xff]  ;;  %v56_v9 = vld [vmem:[%s2050_s3 + $0x28] sm:$0xff] }
   0x3   :  { %v1409_v7 = vpack.c.bf16 %v54_v5, %v53_v2 }
   0x4   :  { %1407 = vmatpush3.bf16.msra.mxu0 %v1406_v4 }
   0x5   :  { %1408 = vmatprep.subr.bf16.mxu0 %v1570_v3 }
   0x6   :  { %21 = vsyncpa [#allocation5], 0  ;;  %v1412_v10 = vpack.c.bf16 %v56_v9, %v55_v8  ;;  %v57_v11 = vld [vmem:[%s2050_s3 + $0x30] sm:$0xff]  ;;  %v58_v12 = vld [vmem:[%s2050_s3 + $0x38] sm:$0xff]  ;;  %v45_v23 = vlaneseq  ;;  %v47_v28 = vstv %s2047_s0  ;;  %v1573_v29 = vmov 1.0   ;;  %s1574_s0 = smov 48  }
   0x7   :  { %v1415_v13 = vpack.c.bf16 %v58_v12, %v57_v11  ;;  %v59_v14 = vld [vmem:[%s2050_s3 + $0x40] sm:$0xff]  ;;  %v60_v15 = vld [vmem:[%s2050_s3 + $0x48] sm:$0xff]  ;;  %v61_v17 = vld [vmem:[%s2050_s3 + $0x50] sm:$0xff]  ;;  %vm139_vm2 = vcmask 253952   ;;  %vm153_vm3 = vcmask 261120   ;;  %vm570_vm4 = vcmask 517121  }
   0x8   :  { %1410 = vmatpush3.bf16.msra.mxu0 %v1409_v7  ;;  %v1418_v16 = vpack.c.bf16 %v60_v15, %v59_v14  ;;  %v62_v18 = vld [vmem:[%s2050_s3 + $0x58] sm:$0xff]  ;;  %v63_v20 = vld [vmem:[%s2050_s3 + $0x60] sm:$0xff]  ;;  %v64_v21 = vld [vmem:[%s2050_s3 + $0x68] sm:$0xff]  ;;  %v46_v27 = vand.u32 127, %v45_v23  ;;  %vm572_vm5 = vcmask 518146   ;;  %vm574_vm6 = vcmask 516096  }
   0x9   :  { %1411 = vmatprep.subr.bf16.mxu0 %v1570_v3  ;;  %v1421_v19 = vpack.c.bf16 %v62_v18, %v61_v17  ;;  %v1424_v22 = vpack.c.bf16 %v64_v21, %v63_v20  ;;  %v65_v24 = vld [vmem:[%s2050_s3 + $0x70] sm:$0xff]  ;;  %v66_v25 = vld [vmem:[%s2050_s3 + $0x78] sm:$0xff]  ;;  %v149_v34 = vld [vmem:[%s2052_s5] sm:$0xff]  ;;  %vm262_vm7 = vcmask 523264   ;;  %s1575_s3 = smov 64   ;;  %vm401_vm9 = vcmask 130048  }
   0xa   :  { %v1427_v26 = vpack.c.bf16 %v66_v25, %v65_v24  ;;  %vm48_vm1 = vcmp.eq.s32.totalorder %v46_v27, %v47_v28  ;;  %v150_v35 = vld [vmem:[%s2052_s5 + $0x8] sm:$0xff]  ;;  %v151_v36 = vld [vmem:[%s2052_s5 + $0x10] sm:$0xff]  ;;  %v152_v38 = vld [vmem:[%s2052_s5 + $0x18] sm:$0xff] }
   0xb   :  { %v1430_v37 = vpack.c.bf16 %v150_v35, %v149_v34  ;;  %v1433_v39 = vpack.c.bf16 %v152_v38, %v151_v36  ;;  %v1742_v44 = vld [vmem:[%s2058_s11] sm:$0x7]  ;;  %v255_v49 = vld [vmem:[%s2053_s6 + $0x8] sm:$0xff]  ;;  %v256_v50 = vld [vmem:[%s2053_s6 + $0x10] sm:$0xff] }
   0xc   :  { %1413 = vmatpush3.bf16.msra.mxu0 %v1412_v10  ;;  %v229_v47 = vld [vmem:[%s2049_s2] sm:$0x7]  ;;  %v257_v52 = vld [vmem:[%s2053_s6 + $0x18] sm:$0xff]  ;;  %v259_v55 = vld [vmem:[%s2053_s6 + $0x28] sm:$0xff] }
   0xd   :  { %1414 = vmatprep.subr.bf16.mxu0 %v1570_v3  ;;  %1431 = vmatpush3.bf16.msra.mxu1 %v1430_v37  ;;  %v254_v48 = vld [vmem:[%s2053_s6] sm:$0xff]  ;;  %571 = vst.msk [vmem:[%s2061_s14 - $0x1] sm:$0x2] %vm570_vm4, %v229_v47  ;;  %v1439_v53 = vpack.c.bf16 %v257_v52, %v256_v50  ;;  %v260_v57 = vld [vmem:[%s2053_s6 + $0x30] sm:$0xff]  ;;  %v261_v58 = vld [vmem:[%s2053_s6 + $0x38] sm:$0xff] }
   0xe   :  { %1432 = vmatprep.subr.bf16.mxu1 %v1570_v3  ;;  %573 = vst.msk [vmem:[%s2061_s14 - $0x1] sm:$0x4] %vm572_vm5, %v229_v47  ;;  %v1436_v51 = vpack.c.bf16 %v255_v49, %v254_v48  ;;  %v258_v54 = vld [vmem:[%s2053_s6 + $0x20] sm:$0xff]  ;;  %v1445_v59 = vpack.c.bf16 %v261_v58, %v260_v57  ;;  %v356_v49 = vld [vmem:[%s2056_s9 + $0x8] sm:$0xff] }
   0xf   :  { %v1442_v56 = vpack.c.bf16 %v259_v55, %v258_v54  ;;  %v228_v61 = vld [vmem:[%s2055_s8] sm:$0xf]  ;;  %v387_v57 = vld [vmem:[%s2048_s1 + $0x8] sm:$0xff] }
  0x10   :  { %1416 = vmatpush3.bf16.msra.mxu0 %v1415_v13  ;;  %v238_v1 = vmul.f32 %v229_v47, %v228_v61  ;;  %v1798_v2 = vld [vmem:[%s2057_s10] sm:$0x7] }
  0x11   :  { %1417 = vmatprep.subr.bf16.mxu0 %v1570_v3  ;;  %1434 = vmatpush3.bf16.msra.mxu1 %v1433_v39  ;;  %v355_v48 = vld [vmem:[%s2056_s9] sm:$0xff] }
  0x12   :  { %1435 = vmatprep.subr.bf16.mxu1 %v1570_v3  ;;  %v241_v7 = vrot.slane %v238_v1, 1  ;;  %v244_v9 = vrot.slane %v238_v1, 2  ;;  %v386_v58 = vld [vmem:[%s2048_s1] sm:$0xff] }
  0x14   :  { %1419 = vmatpush3.bf16.msra.mxu0 %v1418_v16 }
  0x15   :  { %1420 = vmatprep.subr.bf16.mxu0 %v1570_v3 }
  0x18   :  { %1422 = vmatpush3.bf16.msra.mxu0 %v1421_v19 }
  0x19   :  { %1423 = vmatprep.subr.bf16.mxu0 %v1570_v3 }
  0x1c   :  { %1425 = vmatpush3.bf16.msra.mxu0 %v1424_v22  ;;  %v358_v22 = vshrl.u32 %v45_v23, 7 }
  0x1d   :  { %1426 = vmatprep.subr.bf16.mxu0 %v1570_v3 }
  0x1e   :  { %v1808_v24 = vsub.s32 0, %v358_v22 }
  0x20   :  { %1428 = vmatpush3.bf16.msra.mxu0 %v1427_v26 }
  0x21   :  { %1462 = vmatprep.subr.bf16.mxu0 %v1570_v3 }
  0x23   :  { %1280 = vmatmul.mubr.msk.f32.vlgmr.msra.gmra.mrb[0].mxu0 %vm48_vm1, %v1573_v29 }
  0x24   :  { %1346 = vmatprep.mubr.msk.f32.mxu0 %vm1571_vm0, %v1572_v6 }
  0xf6   :  { %v1720_v30 = vpop.f32.mrb[0].mxu0 }
  0xf7   :  { %v1281_v31 = vpop.f32.mrb[1].mxu0  ;;  %v138_v32 = vmul.f32 %v1720_v30, %v1720_v30 }
  0xf8   :  { %v337_v31 = vrot.slane %v1798_v2, 1 }
  0xf9   :  { %v140_v33 = vsel %vm139_vm2, %v138_v32, 0.0 }
  0xfa   :  { %141 = vadd.xlane.f32.xlu0 %v140_v33 }
 0x187   :  { %v142_v40 = vpop.xlane.xlu0 %141 }
 0x188   :  { %v144_v41 = vmul.f32 0.03125, %v142_v40 }
 0x18a   :  { %v145_v42 = vadd.f32 1e-05, %v144_v41 }
 0x18c   :  { %1508 = vrsqrt.f32 %v145_v42 }
 0x196   :  { %v1509_v43 = vpop.eup %1508 }
 0x197   :  { %v147_v45 = vmul.f32 %v1509_v43, %v1720_v30 }
 0x199   :  { %v148_v46 = vmul.f32 %v147_v45, %v1742_v44 }
 0x19b   :  { %1291 = vmatmul.mubr.msk.f32.vlgmr.msra.gmra.mrb[0].mxu1 %vm153_vm3, %v148_v46 }
 0x19c   :  { %1309 = vmatprep.mubr.msk.f32.mxu1 %vm1571_vm0, %v1572_v6  ;;  %1437 = vmatpush3.bf16.msra.mxu1 %v1436_v51 }
 0x19d   :  { %1438 = vmatprep.subr.bf16.mxu1 %v1570_v3 }
 0x1a0   :  { %1440 = vmatpush3.bf16.msra.mxu1 %v1439_v53 }
 0x1a1   :  { %1441 = vmatprep.subr.bf16.mxu1 %v1570_v3 }
 0x1a4   :  { %1443 = vmatpush3.bf16.msra.mxu1 %v1442_v56 }
 0x1a5   :  { %1444 = vmatprep.subr.bf16.mxu1 %v1570_v3 }
 0x1a8   :  { %1446 = vmatpush3.bf16.msra.mxu1 %v1445_v59 }
 0x1a9   :  { %1447 = vmatprep.subr.bf16.mxu1 %v1570_v3 }
 0x26e   :  { %v223_v60 = vpop.f32.mrb[0].mxu1 }
 0x26f   :  { %v231_v62 = vrot.slane %v223_v60, 5  ;;  %575 = vst.msk [vmem:[%s2061_s14 + $0x2] sm:$0x1] %vm574_vm6, %v223_v60  ;;  %v1292_v63 = vpop.f32.mrb[1].mxu1  ;;  %v474_v18 = vsub.f32 0.0, %v223_v60 }
 0x271   :  { %v233_v0 = vmul.f32 %v231_v62, %v228_v61  ;;  %v475_v19 = vmul.f32 1.442695, %v474_v18 }
 0x273   :  { %v235_v4 = vrot.slane %v233_v0, 3 }
 0x275   :  { %v237_v5 = vadd.f32 %v235_v4, %v1798_v2 }
 0x277   :  { %v239_v8 = vadd.f32 %v238_v1, %v237_v5 }
 0x279   :  { %v243_v10 = vadd.f32 %v241_v7, %v239_v8  ;;  %v486_v7 = vld [vmem:[%s2054_s7] sm:$0xff]  ;;  %v487_v8 = vld [vmem:[%s2054_s7 + $0x8] sm:$0xff] }
 0x27b   :  { %v246_v11 = vadd.f32 %v244_v9, %v243_v10  ;;  %v1451_v10 = vpack.c.bf16 %v487_v8, %v486_v7 }
 0x27d   :  { %v247_v12 = vsub.f32 0.0, %v246_v11 }
 0x27f   :  { %v248_v13 = vmul.f32 1.442695, %v247_v12  ;;  %v489_v12 = vld [vmem:[%s2054_s7 + $0x18] sm:$0xff] }
 0x281   :  { %1510 = vpow2.f32 %v248_v13 }
 0x28b   :  { %v1511_v14 = vpop.eup %1510 }
 0x28c   :  { %v250_v15 = vadd.f32 1.0, %v1511_v14 }
 0x28e   :  { %1512 = vrcp.f32 %v250_v15  ;;  %v490_v15 = vld [vmem:[%s2054_s7 + $0x20] sm:$0xff] }
 0x28f   :  { %1514 = vpow2.f32 %v475_v19  ;;  %v492_v19 = vld [vmem:[%s2054_s7 + $0x30] sm:$0xff] }
 0x298   :  { %v1513_v16 = vpop.eup %1512 }
 0x299   :  { %v1801_v17 = vmul.f32 %v1513_v16, %v246_v11  ;;  %v1515_v20 = vpop.eup %1514  ;;  %v488_v11 = vld [vmem:[%s2054_s7 + $0x10] sm:$0xff]  ;;  %v491_v16 = vld [vmem:[%s2054_s7 + $0x28] sm:$0xff] }
 0x29a   :  { %v477_v21 = vadd.f32 1.0, %v1515_v20  ;;  %v1454_v14 = vpack.c.bf16 %v489_v12, %v488_v11  ;;  %v1457_v18 = vpack.c.bf16 %v491_v16, %v490_v15  ;;  %v493_v20 = vld [vmem:[%s2054_s7 + $0x38] sm:$0xff] }
 0x29b   :  { %1310 = vmatmul.mubr.msk.f32.vlgmr.msra.gmra.mrb[2].mxu1 %vm262_vm7, %v1801_v17  ;;  %v392_v22 = vrot.slane %v1801_v17, 6 }
 0x29c   :  { %1316 = vmatprep.mubr.msk.f32.mxu1 %vm1571_vm0, %v1572_v6  ;;  %1516 = vrcp.f32 %v477_v21  ;;  %v1460_v21 = vpack.c.bf16 %v493_v20, %v492_v19 }
 0x2a6   :  { %v1517_v28 = vpop.eup %1516 }
 0x2a7   :  { %v480_v29 = vmul.f32 %v1517_v28, %v223_v60 }
 0x36e   :  { %v332_v25 = vpop.f32.mrb[2].mxu1 }
 0x36f   :  { %v1311_v26 = vpop.f32.mrb[3].mxu1  ;;  %v371_v27 = vrot.slane %v332_v25, %v1808_v24  ;;  %v339_v23 = vadd.f32 %v337_v31, %v332_v25 }
 0x371   :  { %378 = vbcast.lane.b32.xlu1 %v371_v27, 328  ;;  %374 = vbcast.lane.b32.xlu0 %v371_v27, 320  ;;  %v341_v32 = vand.u32 2147483647, %v339_v23  ;;  %v340_v45 = vmax.f32 %v339_v23, 0.0 }
 0x373   :  { %v342_v33 = vsub.f32 0.0, %v341_v32 }
 0x375   :  { %396 = vrot.lane.b32.xlu1 %v332_v25, %s1574_s0  ;;  %v343_v34 = vmul.f32 1.442695, %v342_v33  ;;  %v394_v25 = vmul.f32 %v392_v22, %v1798_v2 }
 0x377   :  { %1518 = vpow2.f32 %v343_v34  ;;  %v399_v26 = vrot.slane %v394_v25, 2 }
 0x379   :  { %482 = vrot.lane.b32.xlu1 %v480_v29, %s1575_s3 }
 0x381   :  { %v1519_v35 = vpop.eup %1518 }
 0x382   :  { %v345_v36 = vadd.f32 1.0, %v1519_v35  ;;  %v348_v37 = vmul.f32 -0.5, %v1519_v35  ;;  %v351_v40 = vand.u32 2147483647, %v1519_v35 }
 0x384   :  { %1520 = vlog2.f32 %v345_v36  ;;  %v349_v39 = vadd.f32 1.0, %v348_v37  ;;  %vm352_vm8 = vcmp.lt.f32.partialorder %v351_v40, 0.0004427343  ;;  %v1137_v36 = vld [vmem:[%s2052_s5 + $0x28] sm:$0xff] }
 0x386   :  { %v350_v42 = vmul.f32 %v1519_v35, %v349_v39  ;;  %v1136_v35 = vld [vmem:[%s2052_s5 + $0x20] sm:$0xff] }
 0x387   :  { %v1463_v37 = vpack.c.bf16 %v1137_v36, %v1136_v35 }
 0x389   :  { %1464 = vmatpush3.bf16.msra.mxu0 %v1463_v37 }
 0x38a   :  { %1465 = vmatprep.subr.bf16.mxu0 %v1570_v3 }
 0x38e   :  { %v1521_v38 = vpop.eup %1520 }
 0x38f   :  { %v347_v41 = vmul.f32 0.6931472, %v1521_v38  ;;  %v1139_v38 = vld [vmem:[%s2052_s5 + $0x38] sm:$0xff] }
 0x391   :  { %v353_v43 = vsel %vm352_vm8, %v350_v42, %v347_v41 }
 0x392   :  { %v354_v46 = vadd.f32 %v353_v43, %v340_v45  ;;  %v585_v43 = vrot.slane %v1742_v44, 1 }
 0x394   :  { %v360_v47 = vrot.slane %v354_v46, %v1808_v24  ;;  %v367_v54 = vmul.f32 %v354_v46, %v1801_v17 }
 0x396   :  { %v361_v50 = vmul.f32 %v360_v47, %v355_v48  ;;  %v362_v51 = vmul.f32 %v360_v47, %v356_v49  ;;  %v383_v59 = vrot.slane %v367_v54, %v1808_v24  ;;  %v1143_v48 = vld [vmem:[%s2049_s2 + $0x4] sm:$0x7] }
 0x397   :  { %1169 = vst.msk [vmem:[%s2061_s14 + $0x3] sm:$0x2] %vm570_vm4, %v1143_v48  ;;  %v1144_v49 = vld [vmem:[%s2053_s6 + $0x40] sm:$0xff] }
 0x398   :  { %v363_v52 = vmul.f32 1.442695, %v361_v50  ;;  %v365_v53 = vmul.f32 1.442695, %v362_v51  ;;  %1170 = vst.msk [vmem:[%s2061_s14 + $0x3] sm:$0x4] %vm572_vm5, %v1143_v48 }
 0x399   :  { %v1145_v50 = vld [vmem:[%s2053_s6 + $0x48] sm:$0xff]  ;;  %v1146_v51 = vld [vmem:[%s2053_s6 + $0x50] sm:$0xff] }
 0x39a   :  { %1522 = vpow2.f32 %v363_v52  ;;  %v1469_v52 = vpack.c.bf16 %v1145_v50, %v1144_v49  ;;  %v1154_v50 = vld [vmem:[%s2056_s9 + $0x18] sm:$0xff] }
 0x39b   :  { %1524 = vpow2.f32 %v365_v53  ;;  %v1147_v53 = vld [vmem:[%s2053_s6 + $0x58] sm:$0xff] }
 0x39c   :  { %v1472_v54 = vpack.c.bf16 %v1147_v53, %v1146_v51 }
 0x3a4   :  { %v1523_v55 = vpop.eup %1522 }
 0x3a5   :  { %v1525_v56 = vpop.eup %1524  ;;  %v388_v1 = vmul.f32 %v1523_v55, %v386_v58  ;;  %v1148_v55 = vld [vmem:[%s2053_s6 + $0x60] sm:$0xff]  ;;  %v1150_v58 = vld [vmem:[%s2053_s6 + $0x70] sm:$0xff] }
 0x3a6   :  { %v389_v63 = vmul.f32 %v1525_v56, %v387_v57  ;;  %v1149_v56 = vld [vmem:[%s2053_s6 + $0x68] sm:$0xff] }
 0x3a7   :  { %v1475_v57 = vpack.c.bf16 %v1149_v56, %v1148_v55 }
 0x3e3   :  { %v379_v60 = vpop.permute.xlu1 %378  ;;  %v375_v61 = vpop.permute.xlu0 %374 }
 0x3e4   :  { %v385_v62 = vmul.f32 %v383_v59, %v379_v60  ;;  %v384_v0 = vmul.f32 %v383_v59, %v375_v61  ;;  %v1151_v59 = vld [vmem:[%s2053_s6 + $0x78] sm:$0xff] }
 0x3e5   :  { %v1478_v60 = vpack.c.bf16 %v1151_v59, %v1150_v58 }
 0x3e6   :  { %v391_v4 = vadd.f32 %v389_v63, %v385_v62  ;;  %v390_v5 = vadd.f32 %v388_v1, %v384_v0  ;;  %v1142_v62 = vld [vmem:[%s2055_s8 + $0x4] sm:$0xf] }
 0x3e7   :  { %v397_v13 = vpop.permute.xlu1 %396 }
 0x3e8   :  { %569 = vst.msk [vmem:[%s2060_s13 + $0x8] sm:$0xff] %vm262_vm7, %v391_v4  ;;  %v1448_v9 = vpack.c.bf16 %v391_v4, %v390_v5  ;;  %568 = vst.msk [vmem:[%s2060_s13] sm:$0xff] %vm262_vm7, %v390_v5  ;;  %v680_v4 = vmul.f32 %v1143_v48, %v1142_v62  ;;  %v1948_v5 = vld [vmem:[%s2057_s10 + $0x4] sm:$0x7]  ;;  %v1153_v48 = vld [vmem:[%s2056_s9 + $0x10] sm:$0xff]  ;;  %s1576_s9 = smov [#allocation4]  }
 0x3e9   :  { %s1114_s26 = sshll.u32 %s1576_s9, 4  ;;  %s1115_s26 = int_to_ptr.vmem [resolvable:$true] %s1114_s26 }
 0x3ea   :  { %1449 = vmatpush3.bf16.msra.mxu1 %v1448_v9  ;;  %v683_v9 = vrot.slane %v680_v4, 1  ;;  %v686_v11 = vrot.slane %v680_v4, 2  ;;  %s1550_s2 = scalar_lea.vmem %s1115_s26, 32  ;;  %p1551_p1 = scmp.lt.s32.totalorder %s1115_s26, %s1115_s26 }
 0x3eb   :  { %1450 = vmatprep.subr.bf16.mxu1 %v1570_v3  ;;  %v483_v31 = vpop.permute.xlu1 %482 }
 0x3ed   :  { %1317 = vmatmul.mubr.msk.f32.vlgmr.msra.gmra.mrb[4].mxu1 %vm401_vm9, %v397_v13 }
 0x3ee   :  { %1452 = vmatpush3.bf16.msra.mxu1 %v1451_v10  ;;  %1335 = vmatprep.mubr.msk.f32.mxu1 %vm1571_vm0, %v1572_v6 }
 0x3ef   :  { %1453 = vmatprep.subr.bf16.mxu1 %v1570_v3  ;;  %v1155_v56 = vld [vmem:[%s2048_s1 + $0x10] sm:$0xff] }
 0x3f2   :  { %1455 = vmatpush3.bf16.msra.mxu1 %v1454_v14 }
 0x3f3   :  { %1456 = vmatprep.subr.bf16.mxu1 %v1570_v3 }
 0x3f6   :  { %1458 = vmatpush3.bf16.msra.mxu1 %v1457_v18 }
 0x3f7   :  { %1459 = vmatprep.subr.bf16.mxu1 %v1570_v3 }
 0x3fa   :  { %1461 = vmatpush3.bf16.msra.mxu1 %v1460_v21 }
 0x3fb   :  { %1480 = vmatprep.subr.bf16.mxu1 %v1570_v3 }
 0x4c0   :  { %v470_v27 = vpop.f32.mrb[4].mxu1 }
 0x4c1   :  { %v471_v28 = vadd.f32 %v470_v27, %v399_v26  ;;  %v1318_v29 = vpop.f32.mrb[5].mxu1 }
 0x4c3   :  { %v485_v23 = vmul.f32 %v483_v31, %v471_v28 }
 0x4c5   :  { %1336 = vmatmul.mubr.msk.f32.vlgmr.msra.gmra.mrb[6].mxu1 %vm262_vm7, %v485_v23 }
 0x4c6   :  { %1372 = vmatprep.mubr.msk.f32.mxu1 %vm1571_vm0, %v1572_v6 }
 0x598   :  { %v563_v32 = vpop.f32.mrb[6].mxu1 }
 0x599   :  { %v1875_v33 = vadd.f32 %v563_v32, %v1720_v30  ;;  %v1337_v34 = vpop.f32.mrb[7].mxu1  ;;  %v1138_v30 = vld [vmem:[%s2052_s5 + $0x30] sm:$0xff]  ;;  %v779_v32 = vrot.slane %v1948_v5, 1 }
 0x59a   :  { %v1466_v39 = vpack.c.bf16 %v1139_v38, %v1138_v30 }
 0x59b   :  { %v576_v17 = vmul.f32 %v1875_v33, %v1875_v33 }
 0x59c   :  { %1467 = vmatpush3.bf16.msra.mxu0 %v1466_v39 }
 0x59d   :  { %v577_v2 = vsel %vm139_vm2, %v576_v17, 0.0  ;;  %1468 = vmatprep.subr.bf16.mxu0 %v1570_v3 }
 0x59e   :  { %578 = vadd.xlane.f32.xlu1 %v577_v2 }
 0x62b   :  { %v579_v40 = vpop.xlane.xlu1 %578 }
 0x62c   :  { %v580_v41 = vmul.f32 0.03125, %v579_v40 }
 0x62e   :  { %v581_v42 = vadd.f32 1e-05, %v580_v41 }
 0x630   :  { %1526 = vrsqrt.f32 %v581_v42 }
 0x63a   :  { %v1527_v45 = vpop.eup %1526 }
 0x63b   :  { %v583_v46 = vmul.f32 %v1527_v45, %v1875_v33 }
 0x63d   :  { %v587_v47 = vmul.f32 %v585_v43, %v583_v46 }
 0x63f   :  { %1347 = vmatmul.mubr.msk.f32.vlgmr.msra.gmra.mrb[2].mxu0 %vm153_vm3, %v587_v47 }
 0x640   :  { %1365 = vmatprep.mubr.msk.f32.mxu0 %vm1571_vm0, %v1572_v6  ;;  %1470 = vmatpush3.bf16.msra.mxu0 %v1469_v52 }
 0x641   :  { %1471 = vmatprep.subr.bf16.mxu0 %v1570_v3 }
 0x644   :  { %1473 = vmatpush3.bf16.msra.mxu0 %v1472_v54 }
 0x645   :  { %1474 = vmatprep.subr.bf16.mxu0 %v1570_v3 }
 0x648   :  { %1476 = vmatpush3.bf16.msra.mxu0 %v1475_v57 }
 0x649   :  { %1477 = vmatprep.subr.bf16.mxu0 %v1570_v3 }
 0x64c   :  { %1479 = vmatpush3.bf16.msra.mxu0 %v1478_v60 }
 0x64d   :  { %1495 = vmatprep.subr.bf16.mxu0 %v1570_v3 }
 0x712   :  { %v662_v61 = vpop.f32.mrb[2].mxu0 }
 0x713   :  { %v673_v63 = vrot.slane %v662_v61, 5  ;;  %1171 = vst.msk [vmem:[%s2061_s14 + $0x6] sm:$0x1] %vm574_vm6, %v662_v61  ;;  %v1348_v0 = vpop.f32.mrb[3].mxu0  ;;  %v917_v21 = vsub.f32 0.0, %v662_v61 }
 0x715   :  { %v675_v1 = vmul.f32 %v1142_v62, %v673_v63  ;;  %v918_v22 = vmul.f32 1.442695, %v917_v21  ;;  %v1156_v62 = vld [vmem:[%s2048_s1 + $0x18] sm:$0xff] }
 0x717   :  { %v677_v7 = vrot.slane %v675_v1, 3 }
 0x719   :  { %v679_v8 = vadd.f32 %v1948_v5, %v677_v7 }
 0x71b   :  { %v681_v10 = vadd.f32 %v680_v4, %v679_v8  ;;  %v1159_v8 = vld [vmem:[%s2054_s7 + $0x48] sm:$0xff] }
 0x71d   :  { %v685_v12 = vadd.f32 %v683_v9, %v681_v10 }
 0x71f   :  { %v688_v13 = vadd.f32 %v686_v11, %v685_v12  ;;  %v1160_v11 = vld [vmem:[%s2054_s7 + $0x50] sm:$0xff]  ;;  %v1161_v12 = vld [vmem:[%s2054_s7 + $0x58] sm:$0xff] }
 0x721   :  { %v689_v14 = vsub.f32 0.0, %v688_v13 }
 0x723   :  { %v690_v15 = vmul.f32 1.442695, %v689_v14  ;;  %v1487_v14 = vpack.c.bf16 %v1161_v12, %v1160_v11 }
 0x725   :  { %1528 = vpow2.f32 %v690_v15  ;;  %v1162_v15 = vld [vmem:[%s2054_s7 + $0x60] sm:$0xff] }
 0x72f   :  { %v1529_v16 = vpop.eup %1528 }
 0x730   :  { %v692_v18 = vadd.f32 1.0, %v1529_v16  ;;  %v1163_v16 = vld [vmem:[%s2054_s7 + $0x68] sm:$0xff] }
 0x732   :  { %1530 = vrcp.f32 %v692_v18  ;;  %v1490_v18 = vpack.c.bf16 %v1163_v16, %v1162_v15 }
 0x733   :  { %1532 = vpow2.f32 %v918_v22 }
 0x73c   :  { %v1531_v19 = vpop.eup %1530 }
 0x73d   :  { %v1951_v20 = vmul.f32 %v1531_v19, %v688_v13  ;;  %v1533_v25 = vpop.eup %1532  ;;  %v1165_v19 = vld [vmem:[%s2054_s7 + $0x78] sm:$0xff] }
 0x73e   :  { %v920_v26 = vadd.f32 1.0, %v1533_v25 }
 0x73f   :  { %1366 = vmatmul.mubr.msk.f32.vlgmr.msra.gmra.mrb[4].mxu0 %vm262_vm7, %v1951_v20  ;;  %v836_v22 = vrot.slane %v1951_v20, 6 }
 0x740   :  { %1402 = vmatprep.mubr.msk.f32.mxu0 %vm1571_vm0, %v1572_v6  ;;  %1534 = vrcp.f32 %v920_v26 }
 0x741   :  { %v838_v25 = vmul.f32 %v1948_v5, %v836_v22  ;;  %v1030_v5 = vld [vmem:[%s2051_s4] sm:$0xff] }
 0x743   :  { %v843_v26 = vrot.slane %v838_v25, 2 }
 0x74a   :  { %v1535_v31 = vpop.eup %1534 }
 0x74b   :  { %v923_v23 = vmul.f32 %v1535_v31, %v662_v61 }
 0x812   :  { %v774_v27 = vpop.f32.mrb[4].mxu0 }
 0x813   :  { %v1367_v28 = vpop.f32.mrb[5].mxu0  ;;  %v814_v29 = vrot.slane %v774_v27, %v1808_v24  ;;  %v781_v34 = vadd.f32 %v779_v32, %v774_v27 }
 0x815   :  { %817 = vbcast.lane.b32.xlu0 %v814_v29, 320  ;;  %v783_v17 = vand.u32 2147483647, %v781_v34  ;;  %v782_v45 = vmax.f32 %v781_v34, 0.0 }
 0x817   :  { %v784_v2 = vsub.f32 0.0, %v783_v17 }
 0x819   :  { %821 = vbcast.lane.b32.xlu0 %v814_v29, 328  ;;  %v785_v35 = vmul.f32 1.442695, %v784_v2 }
 0x81b   :  { %1536 = vpow2.f32 %v785_v35 }
 0x81d   :  { %840 = vrot.lane.b32.xlu0 %v774_v27, %s1574_s0 }
 0x821   :  { %925 = vrot.lane.b32.xlu0 %v923_v23, %s1575_s3 }
 0x825   :  { %v1537_v36 = vpop.eup %1536 }
 0x826   :  { %v787_v37 = vadd.f32 1.0, %v1537_v36  ;;  %v790_v30 = vmul.f32 -0.5, %v1537_v36  ;;  %v793_v40 = vand.u32 2147483647, %v1537_v36 }
 0x828   :  { %1538 = vlog2.f32 %v787_v37  ;;  %v791_v39 = vadd.f32 1.0, %v790_v30  ;;  %vm794_vm10 = vcmp.lt.f32.partialorder %v793_v40, 0.0004427343  ;;  %v1033_v37 = vld [vmem:[%s2051_s4 + $0x18] sm:$0xff] }
 0x82a   :  { %v792_v42 = vmul.f32 %v1537_v36, %v791_v39 }
 0x832   :  { %v1539_v38 = vpop.eup %1538 }
 0x833   :  { %v789_v41 = vmul.f32 0.6931472, %v1539_v38 }
 0x835   :  { %v795_v43 = vsel %vm794_vm10, %v792_v42, %v789_v41  ;;  %v1027_v41 = vrot.slane %v1742_v44, 2 }
 0x836   :  { %v796_v46 = vadd.f32 %v795_v43, %v782_v45 }
 0x838   :  { %v803_v47 = vrot.slane %v796_v46, %v1808_v24  ;;  %v810_v54 = vmul.f32 %v796_v46, %v1951_v20  ;;  %v1031_v20 = vld [vmem:[%s2051_s4 + $0x8] sm:$0xff] }
 0x839   :  { %v1496_v36 = vpack.c.bf16 %v1031_v20, %v1030_v5 }
 0x83a   :  { %v804_v49 = vmul.f32 %v1153_v48, %v803_v47  ;;  %v805_v51 = vmul.f32 %v1154_v50, %v803_v47  ;;  %v826_v57 = vrot.slane %v810_v54, %v1808_v24  ;;  %v1158_v24 = vld [vmem:[%s2054_s7 + $0x40] sm:$0xff] }
 0x83b   :  { %v1484_v10 = vpack.c.bf16 %v1159_v8, %v1158_v24  ;;  %1497 = vmatpush3.bf16.msra.mxu0 %v1496_v36 }
 0x83c   :  { %v806_v52 = vmul.f32 1.442695, %v804_v49  ;;  %v808_v53 = vmul.f32 1.442695, %v805_v51  ;;  %1498 = vmatprep.subr.bf16.mxu0 %v1570_v3 }
 0x83e   :  { %1540 = vpow2.f32 %v806_v52 }
 0x83f   :  { %1542 = vpow2.f32 %v808_v53 }
 0x848   :  { %v1541_v55 = vpop.eup %1540 }
 0x849   :  { %v832_v60 = vmul.f32 %v1541_v55, %v1155_v56  ;;  %v1543_v61 = vpop.eup %1542 }
 0x84a   :  { %v833_v4 = vmul.f32 %v1543_v61, %v1156_v62 }
 0x887   :  { %v818_v58 = vpop.permute.xlu0 %817 }
 0x888   :  { %v827_v59 = vmul.f32 %v826_v57, %v818_v58 }
 0x88a   :  { %v834_v63 = vadd.f32 %v832_v60, %v827_v59 }
 0x88b   :  { %v822_v0 = vpop.permute.xlu0 %821 }
 0x88c   :  { %1167 = vst.msk [vmem:[%s2060_s13 + $0x10] sm:$0xff] %vm262_vm7, %v834_v63  ;;  %v828_v1 = vmul.f32 %v826_v57, %v822_v0 }
 0x88e   :  { %v835_v7 = vadd.f32 %v833_v4, %v828_v1 }
 0x88f   :  { %v841_v13 = vpop.permute.xlu0 %840 }
 0x890   :  { %v1481_v9 = vpack.c.bf16 %v835_v7, %v834_v63  ;;  %1168 = vst.msk [vmem:[%s2060_s13 + $0x18] sm:$0xff] %vm262_vm7, %v835_v7 }
 0x892   :  { %1482 = vmatpush3.bf16.msra.mxu1 %v1481_v9 }
 0x893   :  { %1483 = vmatprep.subr.bf16.mxu1 %v1570_v3  ;;  %v926_v31 = vpop.permute.xlu0 %925 }
 0x895   :  { %1373 = vmatmul.mubr.msk.f32.vlgmr.msra.gmra.mrb[8].mxu1 %vm401_vm9, %v841_v13 }
 0x896   :  { %1485 = vmatpush3.bf16.msra.mxu1 %v1484_v10  ;;  %1391 = vmatprep.mubr.msk.f32.mxu1 %vm1571_vm0, %v1572_v6  ;;  %v1164_v6 = vld [vmem:[%s2054_s7 + $0x70] sm:$0xff] }
 0x897   :  { %1486 = vmatprep.subr.bf16.mxu1 %v1570_v3  ;;  %v1493_v21 = vpack.c.bf16 %v1165_v19, %v1164_v6 }
 0x89a   :  { %1488 = vmatpush3.bf16.msra.mxu1 %v1487_v14 }
 0x89b   :  { %1489 = vmatprep.subr.bf16.mxu1 %v1570_v3 }
 0x89e   :  { %1491 = vmatpush3.bf16.msra.mxu1 %v1490_v18 }
 0x89f   :  { %1492 = vmatprep.subr.bf16.mxu1 %v1570_v3 }
 0x8a2   :  { %1494 = vmatpush3.bf16.msra.mxu1 %v1493_v21 }
 0x968   :  { %v913_v27 = vpop.f32.mrb[8].mxu1 }
 0x969   :  { %v914_v28 = vadd.f32 %v913_v27, %v843_v26  ;;  %v1374_v29 = vpop.f32.mrb[9].mxu1 }
 0x96b   :  { %v928_v23 = vmul.f32 %v926_v31, %v914_v28 }
 0x96d   :  { %1392 = vmatmul.mubr.msk.f32.vlgmr.msra.gmra.mrb[10].mxu1 %vm262_vm7, %v928_v23 }
 0xa40   :  { %v1007_v32 = vpop.f32.mrb[10].mxu1 }
 0xa41   :  { %v1011_v34 = vadd.f32 %v1007_v32, %v1875_v33  ;;  %v1393_v17 = vpop.f32.mrb[11].mxu1  ;;  %v1032_v33 = vld [vmem:[%s2051_s4 + $0x10] sm:$0xff]  ;;  %s1546_s4 = scalar_lea.vmem %s1115_s26, 16 }
 0xa42   :  { %v1499_v30 = vpack.c.bf16 %v1033_v37, %v1032_v33  ;;  %p1547_p0 = scmp.ne.s32.totalorder %s1115_s26, %s1546_s4  ;;  %p1552_p2 = scmp.lt.s32.totalorder %s1550_s2, %s1546_s4 }
 0xa43   :  { %v1019_v2 = vmul.f32 %v1011_v34, %v1011_v34 }
 0xa44   :  { %1500 = vmatpush3.bf16.msra.mxu0 %v1499_v30  ;;  %p1553_p3 = por %p1552_p2, %p1551_p1 }
 0xa45   :  { %v1020_v35 = vsel %vm139_vm2, %v1019_v2, 0.0 }
 0xa46   :  { %1021 = vadd.xlane.f32.xlu0 %v1020_v35  ;;  %p1554_p4 = pnand %p1553_p3, %p1547_p0 }
 0xad3   :  { %v1022_v38 = vpop.xlane.xlu0 %1021 }
 0xad4   :  { %v1023_v39 = vmul.f32 0.03125, %v1022_v38 }
 0xad6   :  { %v1024_v40 = vadd.f32 1e-05, %v1023_v39 }
 0xad8   :  { %1544 = vrsqrt.f32 %v1024_v40 }
 0xae2   :  { %v1545_v42 = vpop.eup %1544 }
 0xae3   :  { %v1026_v43 = vmul.f32 %v1545_v42, %v1011_v34 }
 0xae5   :  { %v1029_v45 = vmul.f32 %v1027_v41, %v1026_v43 }
 0xae7   :  { %1403 = vmatmul.mubr.msk.f32.vlgmr.msra.gmra.mrb[6].mxu0 %vm153_vm3, %v1029_v45 }
 0xbba   :  { %v1103_v3 = vpop.f32.mrb[6].mxu0 }
 0xbbb   :  { %1107 = vst [vmem:[#allocation4] sm:$0x1] %v1103_v3  ;;  %v1404_v46 = vpop.f32.mrb[7].mxu0 }
 0xbbc   :  { %1557 = shalt.err (!%p1554_p4)
}
 0xbbd   :  { %s1558_s28 = scalar_lea.hbm %s2059_s12, 16 }
 0xbbe   :  { %p1559_p5 = scmp.ne.s32.totalorder %s2059_s12, %s1558_s28  ;;  %p1562_p6 = scmp.lt.u32.totalorder %s1558_s28, %s2059_s12 }
 0xbc0   :  { %p1564_p7 = pnand %p1562_p6, %p1559_p5 }
 0xbc2   :  { %1567 = shalt.err (!%p1564_p7)
}
 0xbc3   :  { %1117 = dma.vmem_to_hbm [thread:$0]  %s1115_s26, 16, %s2059_s12, [#allocation5]  }
 0xbc4   :  { %1568 = dma.done.wait [#allocation5], 16  }
 0xbc5   :  { %1569 = vsyncadd [#allocation5], 4294967280 }
 0xbc6   :  { %1129 = vsyncpa [#allocation5], 1 }

</bundles_post_ra>
